<compile_context>
chip_gen: v5e
topology: v5e:2x2
jax: 0.10.0
libtpu: 0.0.40
codegen_flags: <defaults>
</compile_context>

<pallas_src>
import functools

import jax
import jax.numpy as jnp
from jax.experimental import pallas as pl
from jax.experimental.pallas import tpu as pltpu


def _spatial_attention_kernel(w_ref, x_ref, o_ref, pad_avg_ref, pad_max_ref,
                              *, ksize, pad):
    # w_ref     : SMEM (2, ksize*ksize) f32 -- row 0: avg-channel taps, row 1: max-channel taps
    # x_ref     : VMEM (Bblk, C, H, W)
    # o_ref     : VMEM (Bblk, H, W)
    # pad_*_ref : VMEM (Bblk, H + 2*pad, W + 2*pad) f32 scratch (zero-padded pooled maps)
    x = x_ref[...].astype(jnp.float32)            # upcast: f32 accumulation (v5e / bf16 safe)
    c = x.shape[1]

    avg = jnp.sum(x, axis=1) * (1.0 / c)          # (B, H, W) channel mean
    mx = jnp.max(x, axis=1)                       # (B, H, W) channel max

    bblk, hp, wp = pad_avg_ref.shape
    h = hp - 2 * pad
    w = wp - 2 * pad

    # Zero-padded pooled maps in VMEM scratch (zero pad == "same" conv padding).
    pad_avg_ref[...] = jnp.zeros_like(pad_avg_ref)
    pad_max_ref[...] = jnp.zeros_like(pad_max_ref)
    pad_avg_ref[:, pad:pad + h, pad:pad + w] = avg
    pad_max_ref[:, pad:pad + h, pad:pad + w] = mx

    # 2-in / 1-out "same" cross-correlation as an unrolled tap loop of
    # scalar(SMEM) * tile FMAs on VMEM-resident data (MXU intentionally unused:
    # a 2x7x7 conv is pure fill/drain latency on the systolic array).
    acc = jnp.zeros((bblk, h, w), jnp.float32)
    for kh in range(ksize):
        for kw in range(ksize):
            idx = kh * ksize + kw
            w_a = w_ref[0, idx]
            w_m = w_ref[1, idx]
            acc = acc + w_a * pad_avg_ref[:, kh:kh + h, kw:kw + w]
            acc = acc + w_m * pad_max_ref[:, kh:kh + h, kw:kw + w]

    o_ref[...] = jax.nn.sigmoid(acc).astype(o_ref.dtype)


def _pick_block_n(n, c, h, w, itemsize, vmem_budget_bytes=8 << 20):
    """Batch rows per grid step: amortize per-step overhead, stay VMEM-safe,
    and keep >=2 grid steps when n >= 2 so both v7x TensorCores are used."""
    per_row = max(1, c * h * w * itemsize)
    cap = max(1, vmem_budget_bytes // per_row)
    target = max(1, (n + 1) // 2)          # >= 2 parallel steps when n >= 2
    bn = int(min(cap, target, n))
    while n % bn != 0:                     # uniform blocks (no ragged tail)
        bn -= 1
    return bn


def spatial_attention(x_nchw, w_conv, *, block_n=None):
    """x_nchw: (N, C, H, W); w_conv: (1, 2, k, k) Conv2d weight (k in {3, 7}), no bias."""
    n, c, h, w = x_nchw.shape
    ksize = int(w_conv.shape[-1])
    assert ksize in (3, 7), "kernel size must be 3 or 7"
    pad = (ksize - 1) // 2

    if block_n is None:
        block_n = _pick_block_n(n, c, h, w, x_nchw.dtype.itemsize)
    grid = (n // block_n,)

    # channel 0 of the concat is the avg map, channel 1 is the max map.
    w_flat = w_conv.reshape(2, ksize * ksize).astype(jnp.float32)

    kernel = functools.partial(_spatial_attention_kernel, ksize=ksize, pad=pad)

    cost = pl.CostEstimate(
        flops=2 * n * c * h * w + 4 * ksize * ksize * n * h * w,
        transcendentals=n * h * w,
        bytes_accessed=x_nchw.size * x_nchw.dtype.itemsize
        + n * h * w * x_nchw.dtype.itemsize,
    )

    # TODO(synk): for very large C*H*W (e.g. C=512, H=W=64+) add a channel-block
    # grid axis ("arbitrary") with running sum/max scratch accumulators so the
    # per-step block stays bounded on v7x's 64 MiB VMEM; unnecessary at these sizes.
    out = pl.pallas_call(
        kernel,
        out_shape=jax.ShapeDtypeStruct((n, h, w), x_nchw.dtype),
        grid_spec=pltpu.PrefetchScalarGridSpec(
            num_scalar_prefetch=1,          # conv weights -> SMEM
            grid=grid,
            in_specs=[
                pl.BlockSpec((block_n, c, h, w), lambda b, w_sref: (b, 0, 0, 0)),
            ],
            out_specs=pl.BlockSpec((block_n, h, w), lambda b, w_sref: (b, 0, 0)),
            scratch_shapes=[
                pltpu.VMEM((block_n, h + 2 * pad, w + 2 * pad), jnp.float32),
                pltpu.VMEM((block_n, h + 2 * pad, w + 2 * pad), jnp.float32),
            ],
        ),
        compiler_params=pltpu.CompilerParams(
            dimension_semantics=("parallel",)),
        cost_estimate=cost,
    )(w_flat, x_nchw)

    return out.reshape(n, 1, h, w)


def spatial_attention_ref(x_nchw, w_conv):
    """Pure-JAX reference mirroring the PyTorch forward."""
    ksize = w_conv.shape[-1]
    pad = (ksize - 1) // 2
    avg = jnp.mean(x_nchw, axis=1, keepdims=True)
    mx = jnp.max(x_nchw, axis=1, keepdims=True)
    xc = jnp.concatenate([avg, mx], axis=1)                  # (N, 2, H, W)
    y = jax.lax.conv_general_dilated(
        xc, w_conv, window_strides=(1, 1),
        padding=((pad, pad), (pad, pad)),
        dimension_numbers=("NCHW", "OIHW", "NCHW"))
    return jax.nn.sigmoid(y)


if __name__ == "__main__":
    N, C, H, W = 2, 4, 16, 16
    ksize = 7

    key = jax.random.PRNGKey(0)
    kx, kw = jax.random.split(key)
    x = jax.random.normal(kx, (N, C, H, W), dtype=jnp.float32)
    # Conv2d(2 -> 1, kernel_size=7, padding=3, bias=False) weight.
    w_conv = 0.1 * jax.random.normal(kw, (1, 2, ksize, ksize), dtype=jnp.float32)

    out = spatial_attention(x, w_conv)
    out = jax.block_until_ready(out)

    ref = spatial_attention_ref(x, w_conv)
    assert out.shape == (N, 1, H, W)
    assert jnp.allclose(out, ref, atol=1e-5, rtol=1e-5), "Pallas output mismatch vs reference"

    print("KERNEL_OK")
</pallas_src>

<mosaic_0001>
module attributes {stable_mosaic.version = 11 : i64} {
  func.func @_spatial_attention_kernel(%arg0: i32, %arg1: memref<2x49xf32, #tpu.memory_space<smem>>, %arg2: memref<1x4x16x16xf32, #tpu.memory_space<vmem>>, %arg3: memref<1x16x16xf32, #tpu.memory_space<vmem>>, %arg4: memref<1x22x22xf32, #tpu.memory_space<vmem>>, %arg5: memref<1x22x22xf32, #tpu.memory_space<vmem>>) attributes {dimension_semantics = [#tpu.dimension_semantics<parallel>], iteration_bounds = array<i64: 2>, scalar_prefetch = 1 : i64, scratch_operands = 2 : i64, tpu.core_type = #tpu.core_type<tc>, window_params = [{transform_indices = @transform_0, window_bounds = array<i64: 1, 4, 16, 16>}, {transform_indices = @transform_1, window_bounds = array<i64: 1, 16, 16>}]} {
    %c0 = arith.constant 0 : index
    %c0_0 = arith.constant 0 : index
    %c0_1 = arith.constant 0 : index
    %c0_2 = arith.constant 0 : index
    %0 = vector.load %arg2[%c0, %c0_0, %c0_1, %c0_2] : memref<1x4x16x16xf32, #tpu.memory_space<vmem>>, vector<1x4x16x16xf32>
    %cst = arith.constant dense<0.000000e+00> : vector<1x16x16xf32>
    %1 = vector.multi_reduction <add>, %0, %cst [1] : vector<1x4x16x16xf32> to vector<1x16x16xf32>
    %cst_3 = arith.constant 2.500000e-01 : f32
    %2 = vector.broadcast %cst_3 : f32 to vector<1x16x16xf32>
    %3 = arith.mulf %1, %2 : vector<1x16x16xf32>
    %cst_4 = arith.constant dense<0xFF800000> : vector<1x16x16xf32>
    %4 = vector.multi_reduction <maximumf>, %0, %cst_4 [1] : vector<1x4x16x16xf32> to vector<1x16x16xf32>
    %cst_5 = arith.constant 0.000000e+00 : f32
    %5 = vector.broadcast %cst_5 : f32 to vector<1x22x22xf32>
    %c0_6 = arith.constant 0 : index
    %c0_7 = arith.constant 0 : index
    %c0_8 = arith.constant 0 : index
    %6 = vector.load %arg4[%c0_6, %c0_7, %c0_8] : memref<1x22x22xf32, #tpu.memory_space<vmem>>, vector<1x22x22xf32>
    tpu.vector_store %arg4[%c0_6, %c0_7, %c0_8], %5 {strides = array<i32>} : memref<1x22x22xf32, #tpu.memory_space<vmem>>, vector<1x22x22xf32>,
    %cst_9 = arith.constant 0.000000e+00 : f32
    %7 = vector.broadcast %cst_9 : f32 to vector<1x22x22xf32>
    %c0_10 = arith.constant 0 : index
    %c0_11 = arith.constant 0 : index
    %c0_12 = arith.constant 0 : index
    %8 = vector.load %arg5[%c0_10, %c0_11, %c0_12] : memref<1x22x22xf32, #tpu.memory_space<vmem>>, vector<1x22x22xf32>
    tpu.vector_store %arg5[%c0_10, %c0_11, %c0_12], %7 {strides = array<i32>} : memref<1x22x22xf32, #tpu.memory_space<vmem>>, vector<1x22x22xf32>,
    %c0_13 = arith.constant 0 : index
    %c3 = arith.constant 3 : index
    %c3_14 = arith.constant 3 : index
    %9 = vector.load %arg4[%c0_13, %c3, %c3_14] : memref<1x22x22xf32, #tpu.memory_space<vmem>>, vector<1x16x16xf32>
    tpu.vector_store %arg4[%c0_13, %c3, %c3_14], %3 {strides = array<i32>} : memref<1x22x22xf32, #tpu.memory_space<vmem>>, vector<1x16x16xf32>,
    %c0_15 = arith.constant 0 : index
    %c3_16 = arith.constant 3 : index
    %c3_17 = arith.constant 3 : index
    %10 = vector.load %arg5[%c0_15, %c3_16, %c3_17] : memref<1x22x22xf32, #tpu.memory_space<vmem>>, vector<1x16x16xf32>
    tpu.vector_store %arg5[%c0_15, %c3_16, %c3_17], %4 {strides = array<i32>} : memref<1x22x22xf32, #tpu.memory_space<vmem>>, vector<1x16x16xf32>,
    %cst_18 = arith.constant 0.000000e+00 : f32
    %11 = vector.broadcast %cst_18 : f32 to vector<1x16x16xf32>
    %c0_19 = arith.constant 0 : index
    %c0_20 = arith.constant 0 : index
    %12 = memref.load %arg1[%c0_19, %c0_20] : memref<2x49xf32, #tpu.memory_space<smem>>
    %c1 = arith.constant 1 : index
    %c0_21 = arith.constant 0 : index
    %13 = memref.load %arg1[%c1, %c0_21] : memref<2x49xf32, #tpu.memory_space<smem>>
    %c0_22 = arith.constant 0 : index
    %c0_23 = arith.constant 0 : index
    %c0_24 = arith.constant 0 : index
    %14 = vector.load %arg4[%c0_22, %c0_23, %c0_24] : memref<1x22x22xf32, #tpu.memory_space<vmem>>, vector<1x16x16xf32>
    %15 = vector.broadcast %12 : f32 to vector<1x16x16xf32>
    %16 = arith.mulf %15, %14 : vector<1x16x16xf32>
    %17 = arith.addf %11, %16 : vector<1x16x16xf32>
    %c0_25 = arith.constant 0 : index
    %c0_26 = arith.constant 0 : index
    %c0_27 = arith.constant 0 : index
    %18 = vector.load %arg5[%c0_25, %c0_26, %c0_27] : memref<1x22x22xf32, #tpu.memory_space<vmem>>, vector<1x16x16xf32>
    %19 = vector.broadcast %13 : f32 to vector<1x16x16xf32>
    %20 = arith.mulf %19, %18 : vector<1x16x16xf32>
    %21 = arith.addf %17, %20 : vector<1x16x16xf32>
    %c0_28 = arith.constant 0 : index
    %c1_29 = arith.constant 1 : index
    %22 = memref.load %arg1[%c0_28, %c1_29] : memref<2x49xf32, #tpu.memory_space<smem>>
    %c1_30 = arith.constant 1 : index
    %c1_31 = arith.constant 1 : index
    %23 = memref.load %arg1[%c1_30, %c1_31] : memref<2x49xf32, #tpu.memory_space<smem>>
    %c0_32 = arith.constant 0 : index
    %c0_33 = arith.constant 0 : index
    %c1_34 = arith.constant 1 : index
    %24 = vector.load %arg4[%c0_32, %c0_33, %c1_34] : memref<1x22x22xf32, #tpu.memory_space<vmem>>, vector<1x16x16xf32>
    %25 = vector.broadcast %22 : f32 to vector<1x16x16xf32>
    %26 = arith.mulf %25, %24 : vector<1x16x16xf32>
    %27 = arith.addf %21, %26 : vector<1x16x16xf32>
    %c0_35 = arith.constant 0 : index
    %c0_36 = arith.constant 0 : index
    %c1_37 = arith.constant 1 : index
    %28 = vector.load %arg5[%c0_35, %c0_36, %c1_37] : memref<1x22x22xf32, #tpu.memory_space<vmem>>, vector<1x16x16xf32>
    %29 = vector.broadcast %23 : f32 to vector<1x16x16xf32>
    %30 = arith.mulf %29, %28 : vector<1x16x16xf32>
    %31 = arith.addf %27, %30 : vector<1x16x16xf32>
    %c0_38 = arith.constant 0 : index
    %c2 = arith.constant 2 : index
    %32 = memref.load %arg1[%c0_38, %c2] : memref<2x49xf32, #tpu.memory_space<smem>>
    %c1_39 = arith.constant 1 : index
    %c2_40 = arith.constant 2 : index
    %33 = memref.load %arg1[%c1_39, %c2_40] : memref<2x49xf32, #tpu.memory_space<smem>>
    %c0_41 = arith.constant 0 : index
    %c0_42 = arith.constant 0 : index
    %c2_43 = arith.constant 2 : index
    %34 = vector.load %arg4[%c0_41, %c0_42, %c2_43] : memref<1x22x22xf32, #tpu.memory_space<vmem>>, vector<1x16x16xf32>
    %35 = vector.broadcast %32 : f32 to vector<1x16x16xf32>
    %36 = arith.mulf %35, %34 : vector<1x16x16xf32>
    %37 = arith.addf %31, %36 : vector<1x16x16xf32>
    %c0_44 = arith.constant 0 : index
    %c0_45 = arith.constant 0 : index
    %c2_46 = arith.constant 2 : index
    %38 = vector.load %arg5[%c0_44, %c0_45, %c2_46] : memref<1x22x22xf32, #tpu.memory_space<vmem>>, vector<1x16x16xf32>
    %39 = vector.broadcast %33 : f32 to vector<1x16x16xf32>
    %40 = arith.mulf %39, %38 : vector<1x16x16xf32>
    %41 = arith.addf %37, %40 : vector<1x16x16xf32>
    %c0_47 = arith.constant 0 : index
    %c3_48 = arith.constant 3 : index
    %42 = memref.load %arg1[%c0_47, %c3_48] : memref<2x49xf32, #tpu.memory_space<smem>>
    %c1_49 = arith.constant 1 : index
    %c3_50 = arith.constant 3 : index
    %43 = memref.load %arg1[%c1_49, %c3_50] : memref<2x49xf32, #tpu.memory_space<smem>>
    %c0_51 = arith.constant 0 : index
    %c0_52 = arith.constant 0 : index
    %c3_53 = arith.constant 3 : index
    %44 = vector.load %arg4[%c0_51, %c0_52, %c3_53] : memref<1x22x22xf32, #tpu.memory_space<vmem>>, vector<1x16x16xf32>
    %45 = vector.broadcast %42 : f32 to vector<1x16x16xf32>
    %46 = arith.mulf %45, %44 : vector<1x16x16xf32>
    %47 = arith.addf %41, %46 : vector<1x16x16xf32>
    %c0_54 = arith.constant 0 : index
    %c0_55 = arith.constant 0 : index
    %c3_56 = arith.constant 3 : index
    %48 = vector.load %arg5[%c0_54, %c0_55, %c3_56] : memref<1x22x22xf32, #tpu.memory_space<vmem>>, vector<1x16x16xf32>
    %49 = vector.broadcast %43 : f32 to vector<1x16x16xf32>
    %50 = arith.mulf %49, %48 : vector<1x16x16xf32>
    %51 = arith.addf %47, %50 : vector<1x16x16xf32>
    %c0_57 = arith.constant 0 : index
    %c4 = arith.constant 4 : index
    %52 = memref.load %arg1[%c0_57, %c4] : memref<2x49xf32, #tpu.memory_space<smem>>
    %c1_58 = arith.constant 1 : index
    %c4_59 = arith.constant 4 : index
    %53 = memref.load %arg1[%c1_58, %c4_59] : memref<2x49xf32, #tpu.memory_space<smem>>
    %c0_60 = arith.constant 0 : index
    %c0_61 = arith.constant 0 : index
    %c4_62 = arith.constant 4 : index
    %54 = vector.load %arg4[%c0_60, %c0_61, %c4_62] : memref<1x22x22xf32, #tpu.memory_space<vmem>>, vector<1x16x16xf32>
    %55 = vector.broadcast %52 : f32 to vector<1x16x16xf32>
    %56 = arith.mulf %55, %54 : vector<1x16x16xf32>
    %57 = arith.addf %51, %56 : vector<1x16x16xf32>
    %c0_63 = arith.constant 0 : index
    %c0_64 = arith.constant 0 : index
    %c4_65 = arith.constant 4 : index
    %58 = vector.load %arg5[%c0_63, %c0_64, %c4_65] : memref<1x22x22xf32, #tpu.memory_space<vmem>>, vector<1x16x16xf32>
    %59 = vector.broadcast %53 : f32 to vector<1x16x16xf32>
    %60 = arith.mulf %59, %58 : vector<1x16x16xf32>
    %61 = arith.addf %57, %60 : vector<1x16x16xf32>
    %c0_66 = arith.constant 0 : index
    %c5 = arith.constant 5 : index
    %62 = memref.load %arg1[%c0_66, %c5] : memref<2x49xf32, #tpu.memory_space<smem>>
    %c1_67 = arith.constant 1 : index
    %c5_68 = arith.constant 5 : index
    %63 = memref.load %arg1[%c1_67, %c5_68] : memref<2x49xf32, #tpu.memory_space<smem>>
    %c0_69 = arith.constant 0 : index
    %c0_70 = arith.constant 0 : index
    %c5_71 = arith.constant 5 : index
    %64 = vector.load %arg4[%c0_69, %c0_70, %c5_71] : memref<1x22x22xf32, #tpu.memory_space<vmem>>, vector<1x16x16xf32>
    %65 = vector.broadcast %62 : f32 to vector<1x16x16xf32>
    %66 = arith.mulf %65, %64 : vector<1x16x16xf32>
    %67 = arith.addf %61, %66 : vector<1x16x16xf32>
    %c0_72 = arith.constant 0 : index
    %c0_73 = arith.constant 0 : index
    %c5_74 = arith.constant 5 : index
    %68 = vector.load %arg5[%c0_72, %c0_73, %c5_74] : memref<1x22x22xf32, #tpu.memory_space<vmem>>, vector<1x16x16xf32>
    %69 = vector.broadcast %63 : f32 to vector<1x16x16xf32>
    %70 = arith.mulf %69, %68 : vector<1x16x16xf32>
    %71 = arith.addf %67, %70 : vector<1x16x16xf32>
    %c0_75 = arith.constant 0 : index
    %c6 = arith.constant 6 : index
    %72 = memref.load %arg1[%c0_75, %c6] : memref<2x49xf32, #tpu.memory_space<smem>>
    %c1_76 = arith.constant 1 : index
    %c6_77 = arith.constant 6 : index
    %73 = memref.load %arg1[%c1_76, %c6_77] : memref<2x49xf32, #tpu.memory_space<smem>>
    %c0_78 = arith.constant 0 : index
    %c0_79 = arith.constant 0 : index
    %c6_80 = arith.constant 6 : index
    %74 = vector.load %arg4[%c0_78, %c0_79, %c6_80] : memref<1x22x22xf32, #tpu.memory_space<vmem>>, vector<1x16x16xf32>
    %75 = vector.broadcast %72 : f32 to vector<1x16x16xf32>
    %76 = arith.mulf %75, %74 : vector<1x16x16xf32>
    %77 = arith.addf %71, %76 : vector<1x16x16xf32>
    %c0_81 = arith.constant 0 : index
    %c0_82 = arith.constant 0 : index
    %c6_83 = arith.constant 6 : index
    %78 = vector.load %arg5[%c0_81, %c0_82, %c6_83] : memref<1x22x22xf32, #tpu.memory_space<vmem>>, vector<1x16x16xf32>
    %79 = vector.broadcast %73 : f32 to vector<1x16x16xf32>
    %80 = arith.mulf %79, %78 : vector<1x16x16xf32>
    %81 = arith.addf %77, %80 : vector<1x16x16xf32>
    %c0_84 = arith.constant 0 : index
    %c7 = arith.constant 7 : index
    %82 = memref.load %arg1[%c0_84, %c7] : memref<2x49xf32, #tpu.memory_space<smem>>
    %c1_85 = arith.constant 1 : index
    %c7_86 = arith.constant 7 : index
    %83 = memref.load %arg1[%c1_85, %c7_86] : memref<2x49xf32, #tpu.memory_space<smem>>
    %c0_87 = arith.constant 0 : index
    %c1_88 = arith.constant 1 : index
    %c0_89 = arith.constant 0 : index
    %84 = vector.load %arg4[%c0_87, %c1_88, %c0_89] : memref<1x22x22xf32, #tpu.memory_space<vmem>>, vector<1x16x16xf32>
    %85 = vector.broadcast %82 : f32 to vector<1x16x16xf32>
    %86 = arith.mulf %85, %84 : vector<1x16x16xf32>
    %87 = arith.addf %81, %86 : vector<1x16x16xf32>
    %c0_90 = arith.constant 0 : index
    %c1_91 = arith.constant 1 : index
    %c0_92 = arith.constant 0 : index
    %88 = vector.load %arg5[%c0_90, %c1_91, %c0_92] : memref<1x22x22xf32, #tpu.memory_space<vmem>>, vector<1x16x16xf32>
    %89 = vector.broadcast %83 : f32 to vector<1x16x16xf32>
    %90 = arith.mulf %89, %88 : vector<1x16x16xf32>
    %91 = arith.addf %87, %90 : vector<1x16x16xf32>
    %c0_93 = arith.constant 0 : index
    %c8 = arith.constant 8 : index
    %92 = memref.load %arg1[%c0_93, %c8] : memref<2x49xf32, #tpu.memory_space<smem>>
    %c1_94 = arith.constant 1 : index
    %c8_95 = arith.constant 8 : index
    %93 = memref.load %arg1[%c1_94, %c8_95] : memref<2x49xf32, #tpu.memory_space<smem>>
    %c0_96 = arith.constant 0 : index
    %c1_97 = arith.constant 1 : index
    %c1_98 = arith.constant 1 : index
    %94 = vector.load %arg4[%c0_96, %c1_97, %c1_98] : memref<1x22x22xf32, #tpu.memory_space<vmem>>, vector<1x16x16xf32>
    %95 = vector.broadcast %92 : f32 to vector<1x16x16xf32>
    %96 = arith.mulf %95, %94 : vector<1x16x16xf32>
    %97 = arith.addf %91, %96 : vector<1x16x16xf32>
    %c0_99 = arith.constant 0 : index
    %c1_100 = arith.constant 1 : index
    %c1_101 = arith.constant 1 : index
    %98 = vector.load %arg5[%c0_99, %c1_100, %c1_101] : memref<1x22x22xf32, #tpu.memory_space<vmem>>, vector<1x16x16xf32>
    %99 = vector.broadcast %93 : f32 to vector<1x16x16xf32>
    %100 = arith.mulf %99, %98 : vector<1x16x16xf32>
    %101 = arith.addf %97, %100 : vector<1x16x16xf32>
    %c0_102 = arith.constant 0 : index
    %c9 = arith.constant 9 : index
    %102 = memref.load %arg1[%c0_102, %c9] : memref<2x49xf32, #tpu.memory_space<smem>>
    %c1_103 = arith.constant 1 : index
    %c9_104 = arith.constant 9 : index
    %103 = memref.load %arg1[%c1_103, %c9_104] : memref<2x49xf32, #tpu.memory_space<smem>>
    %c0_105 = arith.constant 0 : index
    %c1_106 = arith.constant 1 : index
    %c2_107 = arith.constant 2 : index
    %104 = vector.load %arg4[%c0_105, %c1_106, %c2_107] : memref<1x22x22xf32, #tpu.memory_space<vmem>>, vector<1x16x16xf32>
    %105 = vector.broadcast %102 : f32 to vector<1x16x16xf32>
    %106 = arith.mulf %105, %104 : vector<1x16x16xf32>
    %107 = arith.addf %101, %106 : vector<1x16x16xf32>
    %c0_108 = arith.constant 0 : index
    %c1_109 = arith.constant 1 : index
    %c2_110 = arith.constant 2 : index
    %108 = vector.load %arg5[%c0_108, %c1_109, %c2_110] : memref<1x22x22xf32, #tpu.memory_space<vmem>>, vector<1x16x16xf32>
    %109 = vector.broadcast %103 : f32 to vector<1x16x16xf32>
    %110 = arith.mulf %109, %108 : vector<1x16x16xf32>
    %111 = arith.addf %107, %110 : vector<1x16x16xf32>
    %c0_111 = arith.constant 0 : index
    %c10 = arith.constant 10 : index
    %112 = memref.load %arg1[%c0_111, %c10] : memref<2x49xf32, #tpu.memory_space<smem>>
    %c1_112 = arith.constant 1 : index
    %c10_113 = arith.constant 10 : index
    %113 = memref.load %arg1[%c1_112, %c10_113] : memref<2x49xf32, #tpu.memory_space<smem>>
    %c0_114 = arith.constant 0 : index
    %c1_115 = arith.constant 1 : index
    %c3_116 = arith.constant 3 : index
    %114 = vector.load %arg4[%c0_114, %c1_115, %c3_116] : memref<1x22x22xf32, #tpu.memory_space<vmem>>, vector<1x16x16xf32>
    %115 = vector.broadcast %112 : f32 to vector<1x16x16xf32>
    %116 = arith.mulf %115, %114 : vector<1x16x16xf32>
    %117 = arith.addf %111, %116 : vector<1x16x16xf32>
    %c0_117 = arith.constant 0 : index
    %c1_118 = arith.constant 1 : index
    %c3_119 = arith.constant 3 : index
    %118 = vector.load %arg5[%c0_117, %c1_118, %c3_119] : memref<1x22x22xf32, #tpu.memory_space<vmem>>, vector<1x16x16xf32>
    %119 = vector.broadcast %113 : f32 to vector<1x16x16xf32>
    %120 = arith.mulf %119, %118 : vector<1x16x16xf32>
    %121 = arith.addf %117, %120 : vector<1x16x16xf32>
    %c0_120 = arith.constant 0 : index
    %c11 = arith.constant 11 : index
    %122 = memref.load %arg1[%c0_120, %c11] : memref<2x49xf32, #tpu.memory_space<smem>>
    %c1_121 = arith.constant 1 : index
    %c11_122 = arith.constant 11 : index
    %123 = memref.load %arg1[%c1_121, %c11_122] : memref<2x49xf32, #tpu.memory_space<smem>>
    %c0_123 = arith.constant 0 : index
    %c1_124 = arith.constant 1 : index
    %c4_125 = arith.constant 4 : index
    %124 = vector.load %arg4[%c0_123, %c1_124, %c4_125] : memref<1x22x22xf32, #tpu.memory_space<vmem>>, vector<1x16x16xf32>
    %125 = vector.broadcast %122 : f32 to vector<1x16x16xf32>
    %126 = arith.mulf %125, %124 : vector<1x16x16xf32>
    %127 = arith.addf %121, %126 : vector<1x16x16xf32>
    %c0_126 = arith.constant 0 : index
    %c1_127 = arith.constant 1 : index
    %c4_128 = arith.constant 4 : index
    %128 = vector.load %arg5[%c0_126, %c1_127, %c4_128] : memref<1x22x22xf32, #tpu.memory_space<vmem>>, vector<1x16x16xf32>
    %129 = vector.broadcast %123 : f32 to vector<1x16x16xf32>
    %130 = arith.mulf %129, %128 : vector<1x16x16xf32>
    %131 = arith.addf %127, %130 : vector<1x16x16xf32>
    %c0_129 = arith.constant 0 : index
    %c12 = arith.constant 12 : index
    %132 = memref.load %arg1[%c0_129, %c12] : memref<2x49xf32, #tpu.memory_space<smem>>
    %c1_130 = arith.constant 1 : index
    %c12_131 = arith.constant 12 : index
    %133 = memref.load %arg1[%c1_130, %c12_131] : memref<2x49xf32, #tpu.memory_space<smem>>
    %c0_132 = arith.constant 0 : index
    %c1_133 = arith.constant 1 : index
    %c5_134 = arith.constant 5 : index
    %134 = vector.load %arg4[%c0_132, %c1_133, %c5_134] : memref<1x22x22xf32, #tpu.memory_space<vmem>>, vector<1x16x16xf32>
    %135 = vector.broadcast %132 : f32 to vector<1x16x16xf32>
    %136 = arith.mulf %135, %134 : vector<1x16x16xf32>
    %137 = arith.addf %131, %136 : vector<1x16x16xf32>
    %c0_135 = arith.constant 0 : index
    %c1_136 = arith.constant 1 : index
    %c5_137 = arith.constant 5 : index
    %138 = vector.load %arg5[%c0_135, %c1_136, %c5_137] : memref<1x22x22xf32, #tpu.memory_space<vmem>>, vector<1x16x16xf32>
    %139 = vector.broadcast %133 : f32 to vector<1x16x16xf32>
    %140 = arith.mulf %139, %138 : vector<1x16x16xf32>
    %141 = arith.addf %137, %140 : vector<1x16x16xf32>
    %c0_138 = arith.constant 0 : index
    %c13 = arith.constant 13 : index
    %142 = memref.load %arg1[%c0_138, %c13] : memref<2x49xf32, #tpu.memory_space<smem>>
    %c1_139 = arith.constant 1 : index
    %c13_140 = arith.constant 13 : index
    %143 = memref.load %arg1[%c1_139, %c13_140] : memref<2x49xf32, #tpu.memory_space<smem>>
    %c0_141 = arith.constant 0 : index
    %c1_142 = arith.constant 1 : index
    %c6_143 = arith.constant 6 : index
    %144 = vector.load %arg4[%c0_141, %c1_142, %c6_143] : memref<1x22x22xf32, #tpu.memory_space<vmem>>, vector<1x16x16xf32>
    %145 = vector.broadcast %142 : f32 to vector<1x16x16xf32>
    %146 = arith.mulf %145, %144 : vector<1x16x16xf32>
    %147 = arith.addf %141, %146 : vector<1x16x16xf32>
    %c0_144 = arith.constant 0 : index
    %c1_145 = arith.constant 1 : index
    %c6_146 = arith.constant 6 : index
    %148 = vector.load %arg5[%c0_144, %c1_145, %c6_146] : memref<1x22x22xf32, #tpu.memory_space<vmem>>, vector<1x16x16xf32>
    %149 = vector.broadcast %143 : f32 to vector<1x16x16xf32>
    %150 = arith.mulf %149, %148 : vector<1x16x16xf32>
    %151 = arith.addf %147, %150 : vector<1x16x16xf32>
    %c0_147 = arith.constant 0 : index
    %c14 = arith.constant 14 : index
    %152 = memref.load %arg1[%c0_147, %c14] : memref<2x49xf32, #tpu.memory_space<smem>>
    %c1_148 = arith.constant 1 : index
    %c14_149 = arith.constant 14 : index
    %153 = memref.load %arg1[%c1_148, %c14_149] : memref<2x49xf32, #tpu.memory_space<smem>>
    %c0_150 = arith.constant 0 : index
    %c2_151 = arith.constant 2 : index
    %c0_152 = arith.constant 0 : index
    %154 = vector.load %arg4[%c0_150, %c2_151, %c0_152] : memref<1x22x22xf32, #tpu.memory_space<vmem>>, vector<1x16x16xf32>
    %155 = vector.broadcast %152 : f32 to vector<1x16x16xf32>
    %156 = arith.mulf %155, %154 : vector<1x16x16xf32>
    %157 = arith.addf %151, %156 : vector<1x16x16xf32>
    %c0_153 = arith.constant 0 : index
    %c2_154 = arith.constant 2 : index
    %c0_155 = arith.constant 0 : index
    %158 = vector.load %arg5[%c0_153, %c2_154, %c0_155] : memref<1x22x22xf32, #tpu.memory_space<vmem>>, vector<1x16x16xf32>
    %159 = vector.broadcast %153 : f32 to vector<1x16x16xf32>
    %160 = arith.mulf %159, %158 : vector<1x16x16xf32>
    %161 = arith.addf %157, %160 : vector<1x16x16xf32>
    %c0_156 = arith.constant 0 : index
    %c15 = arith.constant 15 : index
    %162 = memref.load %arg1[%c0_156, %c15] : memref<2x49xf32, #tpu.memory_space<smem>>
    %c1_157 = arith.constant 1 : index
    %c15_158 = arith.constant 15 : index
    %163 = memref.load %arg1[%c1_157, %c15_158] : memref<2x49xf32, #tpu.memory_space<smem>>
    %c0_159 = arith.constant 0 : index
    %c2_160 = arith.constant 2 : index
    %c1_161 = arith.constant 1 : index
    %164 = vector.load %arg4[%c0_159, %c2_160, %c1_161] : memref<1x22x22xf32, #tpu.memory_space<vmem>>, vector<1x16x16xf32>
    %165 = vector.broadcast %162 : f32 to vector<1x16x16xf32>
    %166 = arith.mulf %165, %164 : vector<1x16x16xf32>
    %167 = arith.addf %161, %166 : vector<1x16x16xf32>
    %c0_162 = arith.constant 0 : index
    %c2_163 = arith.constant 2 : index
    %c1_164 = arith.constant 1 : index
    %168 = vector.load %arg5[%c0_162, %c2_163, %c1_164] : memref<1x22x22xf32, #tpu.memory_space<vmem>>, vector<1x16x16xf32>
    %169 = vector.broadcast %163 : f32 to vector<1x16x16xf32>
    %170 = arith.mulf %169, %168 : vector<1x16x16xf32>
    %171 = arith.addf %167, %170 : vector<1x16x16xf32>
    %c0_165 = arith.constant 0 : index
    %c16 = arith.constant 16 : index
    %172 = memref.load %arg1[%c0_165, %c16] : memref<2x49xf32, #tpu.memory_space<smem>>
    %c1_166 = arith.constant 1 : index
    %c16_167 = arith.constant 16 : index
    %173 = memref.load %arg1[%c1_166, %c16_167] : memref<2x49xf32, #tpu.memory_space<smem>>
    %c0_168 = arith.constant 0 : index
    %c2_169 = arith.constant 2 : index
    %c2_170 = arith.constant 2 : index
    %174 = vector.load %arg4[%c0_168, %c2_169, %c2_170] : memref<1x22x22xf32, #tpu.memory_space<vmem>>, vector<1x16x16xf32>
    %175 = vector.broadcast %172 : f32 to vector<1x16x16xf32>
    %176 = arith.mulf %175, %174 : vector<1x16x16xf32>
    %177 = arith.addf %171, %176 : vector<1x16x16xf32>
    %c0_171 = arith.constant 0 : index
    %c2_172 = arith.constant 2 : index
    %c2_173 = arith.constant 2 : index
    %178 = vector.load %arg5[%c0_171, %c2_172, %c2_173] : memref<1x22x22xf32, #tpu.memory_space<vmem>>, vector<1x16x16xf32>
    %179 = vector.broadcast %173 : f32 to vector<1x16x16xf32>
    %180 = arith.mulf %179, %178 : vector<1x16x16xf32>
    %181 = arith.addf %177, %180 : vector<1x16x16xf32>
    %c0_174 = arith.constant 0 : index
    %c17 = arith.constant 17 : index
    %182 = memref.load %arg1[%c0_174, %c17] : memref<2x49xf32, #tpu.memory_space<smem>>
    %c1_175 = arith.constant 1 : index
    %c17_176 = arith.constant 17 : index
    %183 = memref.load %arg1[%c1_175, %c17_176] : memref<2x49xf32, #tpu.memory_space<smem>>
    %c0_177 = arith.constant 0 : index
    %c2_178 = arith.constant 2 : index
    %c3_179 = arith.constant 3 : index
    %184 = vector.load %arg4[%c0_177, %c2_178, %c3_179] : memref<1x22x22xf32, #tpu.memory_space<vmem>>, vector<1x16x16xf32>
    %185 = vector.broadcast %182 : f32 to vector<1x16x16xf32>
    %186 = arith.mulf %185, %184 : vector<1x16x16xf32>
    %187 = arith.addf %181, %186 : vector<1x16x16xf32>
    %c0_180 = arith.constant 0 : index
    %c2_181 = arith.constant 2 : index
    %c3_182 = arith.constant 3 : index
    %188 = vector.load %arg5[%c0_180, %c2_181, %c3_182] : memref<1x22x22xf32, #tpu.memory_space<vmem>>, vector<1x16x16xf32>
    %189 = vector.broadcast %183 : f32 to vector<1x16x16xf32>
    %190 = arith.mulf %189, %188 : vector<1x16x16xf32>
    %191 = arith.addf %187, %190 : vector<1x16x16xf32>
    %c0_183 = arith.constant 0 : index
    %c18 = arith.constant 18 : index
    %192 = memref.load %arg1[%c0_183, %c18] : memref<2x49xf32, #tpu.memory_space<smem>>
    %c1_184 = arith.constant 1 : index
    %c18_185 = arith.constant 18 : index
    %193 = memref.load %arg1[%c1_184, %c18_185] : memref<2x49xf32, #tpu.memory_space<smem>>
    %c0_186 = arith.constant 0 : index
    %c2_187 = arith.constant 2 : index
    %c4_188 = arith.constant 4 : index
    %194 = vector.load %arg4[%c0_186, %c2_187, %c4_188] : memref<1x22x22xf32, #tpu.memory_space<vmem>>, vector<1x16x16xf32>
    %195 = vector.broadcast %192 : f32 to vector<1x16x16xf32>
    %196 = arith.mulf %195, %194 : vector<1x16x16xf32>
    %197 = arith.addf %191, %196 : vector<1x16x16xf32>
    %c0_189 = arith.constant 0 : index
    %c2_190 = arith.constant 2 : index
    %c4_191 = arith.constant 4 : index
    %198 = vector.load %arg5[%c0_189, %c2_190, %c4_191] : memref<1x22x22xf32, #tpu.memory_space<vmem>>, vector<1x16x16xf32>
    %199 = vector.broadcast %193 : f32 to vector<1x16x16xf32>
    %200 = arith.mulf %199, %198 : vector<1x16x16xf32>
    %201 = arith.addf %197, %200 : vector<1x16x16xf32>
    %c0_192 = arith.constant 0 : index
    %c19 = arith.constant 19 : index
    %202 = memref.load %arg1[%c0_192, %c19] : memref<2x49xf32, #tpu.memory_space<smem>>
    %c1_193 = arith.constant 1 : index
    %c19_194 = arith.constant 19 : index
    %203 = memref.load %arg1[%c1_193, %c19_194] : memref<2x49xf32, #tpu.memory_space<smem>>
    %c0_195 = arith.constant 0 : index
    %c2_196 = arith.constant 2 : index
    %c5_197 = arith.constant 5 : index
    %204 = vector.load %arg4[%c0_195, %c2_196, %c5_197] : memref<1x22x22xf32, #tpu.memory_space<vmem>>, vector<1x16x16xf32>
    %205 = vector.broadcast %202 : f32 to vector<1x16x16xf32>
    %206 = arith.mulf %205, %204 : vector<1x16x16xf32>
    %207 = arith.addf %201, %206 : vector<1x16x16xf32>
    %c0_198 = arith.constant 0 : index
    %c2_199 = arith.constant 2 : index
    %c5_200 = arith.constant 5 : index
    %208 = vector.load %arg5[%c0_198, %c2_199, %c5_200] : memref<1x22x22xf32, #tpu.memory_space<vmem>>, vector<1x16x16xf32>
    %209 = vector.broadcast %203 : f32 to vector<1x16x16xf32>
    %210 = arith.mulf %209, %208 : vector<1x16x16xf32>
    %211 = arith.addf %207, %210 : vector<1x16x16xf32>
    %c0_201 = arith.constant 0 : index
    %c20 = arith.constant 20 : index
    %212 = memref.load %arg1[%c0_201, %c20] : memref<2x49xf32, #tpu.memory_space<smem>>
    %c1_202 = arith.constant 1 : index
    %c20_203 = arith.constant 20 : index
    %213 = memref.load %arg1[%c1_202, %c20_203] : memref<2x49xf32, #tpu.memory_space<smem>>
    %c0_204 = arith.constant 0 : index
    %c2_205 = arith.constant 2 : index
    %c6_206 = arith.constant 6 : index
    %214 = vector.load %arg4[%c0_204, %c2_205, %c6_206] : memref<1x22x22xf32, #tpu.memory_space<vmem>>, vector<1x16x16xf32>
    %215 = vector.broadcast %212 : f32 to vector<1x16x16xf32>
    %216 = arith.mulf %215, %214 : vector<1x16x16xf32>
    %217 = arith.addf %211, %216 : vector<1x16x16xf32>
    %c0_207 = arith.constant 0 : index
    %c2_208 = arith.constant 2 : index
    %c6_209 = arith.constant 6 : index
    %218 = vector.load %arg5[%c0_207, %c2_208, %c6_209] : memref<1x22x22xf32, #tpu.memory_space<vmem>>, vector<1x16x16xf32>
    %219 = vector.broadcast %213 : f32 to vector<1x16x16xf32>
    %220 = arith.mulf %219, %218 : vector<1x16x16xf32>
    %221 = arith.addf %217, %220 : vector<1x16x16xf32>
    %c0_210 = arith.constant 0 : index
    %c21 = arith.constant 21 : index
    %222 = memref.load %arg1[%c0_210, %c21] : memref<2x49xf32, #tpu.memory_space<smem>>
    %c1_211 = arith.constant 1 : index
    %c21_212 = arith.constant 21 : index
    %223 = memref.load %arg1[%c1_211, %c21_212] : memref<2x49xf32, #tpu.memory_space<smem>>
    %c0_213 = arith.constant 0 : index
    %c3_214 = arith.constant 3 : index
    %c0_215 = arith.constant 0 : index
    %224 = vector.load %arg4[%c0_213, %c3_214, %c0_215] : memref<1x22x22xf32, #tpu.memory_space<vmem>>, vector<1x16x16xf32>
    %225 = vector.broadcast %222 : f32 to vector<1x16x16xf32>
    %226 = arith.mulf %225, %224 : vector<1x16x16xf32>
    %227 = arith.addf %221, %226 : vector<1x16x16xf32>
    %c0_216 = arith.constant 0 : index
    %c3_217 = arith.constant 3 : index
    %c0_218 = arith.constant 0 : index
    %228 = vector.load %arg5[%c0_216, %c3_217, %c0_218] : memref<1x22x22xf32, #tpu.memory_space<vmem>>, vector<1x16x16xf32>
    %229 = vector.broadcast %223 : f32 to vector<1x16x16xf32>
    %230 = arith.mulf %229, %228 : vector<1x16x16xf32>
    %231 = arith.addf %227, %230 : vector<1x16x16xf32>
    %c0_219 = arith.constant 0 : index
    %c22 = arith.constant 22 : index
    %232 = memref.load %arg1[%c0_219, %c22] : memref<2x49xf32, #tpu.memory_space<smem>>
    %c1_220 = arith.constant 1 : index
    %c22_221 = arith.constant 22 : index
    %233 = memref.load %arg1[%c1_220, %c22_221] : memref<2x49xf32, #tpu.memory_space<smem>>
    %c0_222 = arith.constant 0 : index
    %c3_223 = arith.constant 3 : index
    %c1_224 = arith.constant 1 : index
    %234 = vector.load %arg4[%c0_222, %c3_223, %c1_224] : memref<1x22x22xf32, #tpu.memory_space<vmem>>, vector<1x16x16xf32>
    %235 = vector.broadcast %232 : f32 to vector<1x16x16xf32>
    %236 = arith.mulf %235, %234 : vector<1x16x16xf32>
    %237 = arith.addf %231, %236 : vector<1x16x16xf32>
    %c0_225 = arith.constant 0 : index
    %c3_226 = arith.constant 3 : index
    %c1_227 = arith.constant 1 : index
    %238 = vector.load %arg5[%c0_225, %c3_226, %c1_227] : memref<1x22x22xf32, #tpu.memory_space<vmem>>, vector<1x16x16xf32>
    %239 = vector.broadcast %233 : f32 to vector<1x16x16xf32>
    %240 = arith.mulf %239, %238 : vector<1x16x16xf32>
    %241 = arith.addf %237, %240 : vector<1x16x16xf32>
    %c0_228 = arith.constant 0 : index
    %c23 = arith.constant 23 : index
    %242 = memref.load %arg1[%c0_228, %c23] : memref<2x49xf32, #tpu.memory_space<smem>>
    %c1_229 = arith.constant 1 : index
    %c23_230 = arith.constant 23 : index
    %243 = memref.load %arg1[%c1_229, %c23_230] : memref<2x49xf32, #tpu.memory_space<smem>>
    %c0_231 = arith.constant 0 : index
    %c3_232 = arith.constant 3 : index
    %c2_233 = arith.constant 2 : index
    %244 = vector.load %arg4[%c0_231, %c3_232, %c2_233] : memref<1x22x22xf32, #tpu.memory_space<vmem>>, vector<1x16x16xf32>
    %245 = vector.broadcast %242 : f32 to vector<1x16x16xf32>
    %246 = arith.mulf %245, %244 : vector<1x16x16xf32>
    %247 = arith.addf %241, %246 : vector<1x16x16xf32>
    %c0_234 = arith.constant 0 : index
    %c3_235 = arith.constant 3 : index
    %c2_236 = arith.constant 2 : index
    %248 = vector.load %arg5[%c0_234, %c3_235, %c2_236] : memref<1x22x22xf32, #tpu.memory_space<vmem>>, vector<1x16x16xf32>
    %249 = vector.broadcast %243 : f32 to vector<1x16x16xf32>
    %250 = arith.mulf %249, %248 : vector<1x16x16xf32>
    %251 = arith.addf %247, %250 : vector<1x16x16xf32>
    %c0_237 = arith.constant 0 : index
    %c24 = arith.constant 24 : index
    %252 = memref.load %arg1[%c0_237, %c24] : memref<2x49xf32, #tpu.memory_space<smem>>
    %c1_238 = arith.constant 1 : index
    %c24_239 = arith.constant 24 : index
    %253 = memref.load %arg1[%c1_238, %c24_239] : memref<2x49xf32, #tpu.memory_space<smem>>
    %c0_240 = arith.constant 0 : index
    %c3_241 = arith.constant 3 : index
    %c3_242 = arith.constant 3 : index
    %254 = vector.load %arg4[%c0_240, %c3_241, %c3_242] : memref<1x22x22xf32, #tpu.memory_space<vmem>>, vector<1x16x16xf32>
    %255 = vector.broadcast %252 : f32 to vector<1x16x16xf32>
    %256 = arith.mulf %255, %254 : vector<1x16x16xf32>
    %257 = arith.addf %251, %256 : vector<1x16x16xf32>
    %c0_243 = arith.constant 0 : index
    %c3_244 = arith.constant 3 : index
    %c3_245 = arith.constant 3 : index
    %258 = vector.load %arg5[%c0_243, %c3_244, %c3_245] : memref<1x22x22xf32, #tpu.memory_space<vmem>>, vector<1x16x16xf32>
    %259 = vector.broadcast %253 : f32 to vector<1x16x16xf32>
    %260 = arith.mulf %259, %258 : vector<1x16x16xf32>
    %261 = arith.addf %257, %260 : vector<1x16x16xf32>
    %c0_246 = arith.constant 0 : index
    %c25 = arith.constant 25 : index
    %262 = memref.load %arg1[%c0_246, %c25] : memref<2x49xf32, #tpu.memory_space<smem>>
    %c1_247 = arith.constant 1 : index
    %c25_248 = arith.constant 25 : index
    %263 = memref.load %arg1[%c1_247, %c25_248] : memref<2x49xf32, #tpu.memory_space<smem>>
    %c0_249 = arith.constant 0 : index
    %c3_250 = arith.constant 3 : index
    %c4_251 = arith.constant 4 : index
    %264 = vector.load %arg4[%c0_249, %c3_250, %c4_251] : memref<1x22x22xf32, #tpu.memory_space<vmem>>, vector<1x16x16xf32>
    %265 = vector.broadcast %262 : f32 to vector<1x16x16xf32>
    %266 = arith.mulf %265, %264 : vector<1x16x16xf32>
    %267 = arith.addf %261, %266 : vector<1x16x16xf32>
    %c0_252 = arith.constant 0 : index
    %c3_253 = arith.constant 3 : index
    %c4_254 = arith.constant 4 : index
    %268 = vector.load %arg5[%c0_252, %c3_253, %c4_254] : memref<1x22x22xf32, #tpu.memory_space<vmem>>, vector<1x16x16xf32>
    %269 = vector.broadcast %263 : f32 to vector<1x16x16xf32>
    %270 = arith.mulf %269, %268 : vector<1x16x16xf32>
    %271 = arith.addf %267, %270 : vector<1x16x16xf32>
    %c0_255 = arith.constant 0 : index
    %c26 = arith.constant 26 : index
    %272 = memref.load %arg1[%c0_255, %c26] : memref<2x49xf32, #tpu.memory_space<smem>>
    %c1_256 = arith.constant 1 : index
    %c26_257 = arith.constant 26 : index
    %273 = memref.load %arg1[%c1_256, %c26_257] : memref<2x49xf32, #tpu.memory_space<smem>>
    %c0_258 = arith.constant 0 : index
    %c3_259 = arith.constant 3 : index
    %c5_260 = arith.constant 5 : index
    %274 = vector.load %arg4[%c0_258, %c3_259, %c5_260] : memref<1x22x22xf32, #tpu.memory_space<vmem>>, vector<1x16x16xf32>
    %275 = vector.broadcast %272 : f32 to vector<1x16x16xf32>
    %276 = arith.mulf %275, %274 : vector<1x16x16xf32>
    %277 = arith.addf %271, %276 : vector<1x16x16xf32>
    %c0_261 = arith.constant 0 : index
    %c3_262 = arith.constant 3 : index
    %c5_263 = arith.constant 5 : index
    %278 = vector.load %arg5[%c0_261, %c3_262, %c5_263] : memref<1x22x22xf32, #tpu.memory_space<vmem>>, vector<1x16x16xf32>
    %279 = vector.broadcast %273 : f32 to vector<1x16x16xf32>
    %280 = arith.mulf %279, %278 : vector<1x16x16xf32>
    %281 = arith.addf %277, %280 : vector<1x16x16xf32>
    %c0_264 = arith.constant 0 : index
    %c27 = arith.constant 27 : index
    %282 = memref.load %arg1[%c0_264, %c27] : memref<2x49xf32, #tpu.memory_space<smem>>
    %c1_265 = arith.constant 1 : index
    %c27_266 = arith.constant 27 : index
    %283 = memref.load %arg1[%c1_265, %c27_266] : memref<2x49xf32, #tpu.memory_space<smem>>
    %c0_267 = arith.constant 0 : index
    %c3_268 = arith.constant 3 : index
    %c6_269 = arith.constant 6 : index
    %284 = vector.load %arg4[%c0_267, %c3_268, %c6_269] : memref<1x22x22xf32, #tpu.memory_space<vmem>>, vector<1x16x16xf32>
    %285 = vector.broadcast %282 : f32 to vector<1x16x16xf32>
    %286 = arith.mulf %285, %284 : vector<1x16x16xf32>
    %287 = arith.addf %281, %286 : vector<1x16x16xf32>
    %c0_270 = arith.constant 0 : index
    %c3_271 = arith.constant 3 : index
    %c6_272 = arith.constant 6 : index
    %288 = vector.load %arg5[%c0_270, %c3_271, %c6_272] : memref<1x22x22xf32, #tpu.memory_space<vmem>>, vector<1x16x16xf32>
    %289 = vector.broadcast %283 : f32 to vector<1x16x16xf32>
    %290 = arith.mulf %289, %288 : vector<1x16x16xf32>
    %291 = arith.addf %287, %290 : vector<1x16x16xf32>
    %c0_273 = arith.constant 0 : index
    %c28 = arith.constant 28 : index
    %292 = memref.load %arg1[%c0_273, %c28] : memref<2x49xf32, #tpu.memory_space<smem>>
    %c1_274 = arith.constant 1 : index
    %c28_275 = arith.constant 28 : index
    %293 = memref.load %arg1[%c1_274, %c28_275] : memref<2x49xf32, #tpu.memory_space<smem>>
    %c0_276 = arith.constant 0 : index
    %c4_277 = arith.constant 4 : index
    %c0_278 = arith.constant 0 : index
    %294 = vector.load %arg4[%c0_276, %c4_277, %c0_278] : memref<1x22x22xf32, #tpu.memory_space<vmem>>, vector<1x16x16xf32>
    %295 = vector.broadcast %292 : f32 to vector<1x16x16xf32>
    %296 = arith.mulf %295, %294 : vector<1x16x16xf32>
    %297 = arith.addf %291, %296 : vector<1x16x16xf32>
    %c0_279 = arith.constant 0 : index
    %c4_280 = arith.constant 4 : index
    %c0_281 = arith.constant 0 : index
    %298 = vector.load %arg5[%c0_279, %c4_280, %c0_281] : memref<1x22x22xf32, #tpu.memory_space<vmem>>, vector<1x16x16xf32>
    %299 = vector.broadcast %293 : f32 to vector<1x16x16xf32>
    %300 = arith.mulf %299, %298 : vector<1x16x16xf32>
    %301 = arith.addf %297, %300 : vector<1x16x16xf32>
    %c0_282 = arith.constant 0 : index
    %c29 = arith.constant 29 : index
    %302 = memref.load %arg1[%c0_282, %c29] : memref<2x49xf32, #tpu.memory_space<smem>>
    %c1_283 = arith.constant 1 : index
    %c29_284 = arith.constant 29 : index
    %303 = memref.load %arg1[%c1_283, %c29_284] : memref<2x49xf32, #tpu.memory_space<smem>>
    %c0_285 = arith.constant 0 : index
    %c4_286 = arith.constant 4 : index
    %c1_287 = arith.constant 1 : index
    %304 = vector.load %arg4[%c0_285, %c4_286, %c1_287] : memref<1x22x22xf32, #tpu.memory_space<vmem>>, vector<1x16x16xf32>
    %305 = vector.broadcast %302 : f32 to vector<1x16x16xf32>
    %306 = arith.mulf %305, %304 : vector<1x16x16xf32>
    %307 = arith.addf %301, %306 : vector<1x16x16xf32>
    %c0_288 = arith.constant 0 : index
    %c4_289 = arith.constant 4 : index
    %c1_290 = arith.constant 1 : index
    %308 = vector.load %arg5[%c0_288, %c4_289, %c1_290] : memref<1x22x22xf32, #tpu.memory_space<vmem>>, vector<1x16x16xf32>
    %309 = vector.broadcast %303 : f32 to vector<1x16x16xf32>
    %310 = arith.mulf %309, %308 : vector<1x16x16xf32>
    %311 = arith.addf %307, %310 : vector<1x16x16xf32>
    %c0_291 = arith.constant 0 : index
    %c30 = arith.constant 30 : index
    %312 = memref.load %arg1[%c0_291, %c30] : memref<2x49xf32, #tpu.memory_space<smem>>
    %c1_292 = arith.constant 1 : index
    %c30_293 = arith.constant 30 : index
    %313 = memref.load %arg1[%c1_292, %c30_293] : memref<2x49xf32, #tpu.memory_space<smem>>
    %c0_294 = arith.constant 0 : index
    %c4_295 = arith.constant 4 : index
    %c2_296 = arith.constant 2 : index
    %314 = vector.load %arg4[%c0_294, %c4_295, %c2_296] : memref<1x22x22xf32, #tpu.memory_space<vmem>>, vector<1x16x16xf32>
    %315 = vector.broadcast %312 : f32 to vector<1x16x16xf32>
    %316 = arith.mulf %315, %314 : vector<1x16x16xf32>
    %317 = arith.addf %311, %316 : vector<1x16x16xf32>
    %c0_297 = arith.constant 0 : index
    %c4_298 = arith.constant 4 : index
    %c2_299 = arith.constant 2 : index
    %318 = vector.load %arg5[%c0_297, %c4_298, %c2_299] : memref<1x22x22xf32, #tpu.memory_space<vmem>>, vector<1x16x16xf32>
    %319 = vector.broadcast %313 : f32 to vector<1x16x16xf32>
    %320 = arith.mulf %319, %318 : vector<1x16x16xf32>
    %321 = arith.addf %317, %320 : vector<1x16x16xf32>
    %c0_300 = arith.constant 0 : index
    %c31 = arith.constant 31 : index
    %322 = memref.load %arg1[%c0_300, %c31] : memref<2x49xf32, #tpu.memory_space<smem>>
    %c1_301 = arith.constant 1 : index
    %c31_302 = arith.constant 31 : index
    %323 = memref.load %arg1[%c1_301, %c31_302] : memref<2x49xf32, #tpu.memory_space<smem>>
    %c0_303 = arith.constant 0 : index
    %c4_304 = arith.constant 4 : index
    %c3_305 = arith.constant 3 : index
    %324 = vector.load %arg4[%c0_303, %c4_304, %c3_305] : memref<1x22x22xf32, #tpu.memory_space<vmem>>, vector<1x16x16xf32>
    %325 = vector.broadcast %322 : f32 to vector<1x16x16xf32>
    %326 = arith.mulf %325, %324 : vector<1x16x16xf32>
    %327 = arith.addf %321, %326 : vector<1x16x16xf32>
    %c0_306 = arith.constant 0 : index
    %c4_307 = arith.constant 4 : index
    %c3_308 = arith.constant 3 : index
    %328 = vector.load %arg5[%c0_306, %c4_307, %c3_308] : memref<1x22x22xf32, #tpu.memory_space<vmem>>, vector<1x16x16xf32>
    %329 = vector.broadcast %323 : f32 to vector<1x16x16xf32>
    %330 = arith.mulf %329, %328 : vector<1x16x16xf32>
    %331 = arith.addf %327, %330 : vector<1x16x16xf32>
    %c0_309 = arith.constant 0 : index
    %c32 = arith.constant 32 : index
    %332 = memref.load %arg1[%c0_309, %c32] : memref<2x49xf32, #tpu.memory_space<smem>>
    %c1_310 = arith.constant 1 : index
    %c32_311 = arith.constant 32 : index
    %333 = memref.load %arg1[%c1_310, %c32_311] : memref<2x49xf32, #tpu.memory_space<smem>>
    %c0_312 = arith.constant 0 : index
    %c4_313 = arith.constant 4 : index
    %c4_314 = arith.constant 4 : index
    %334 = vector.load %arg4[%c0_312, %c4_313, %c4_314] : memref<1x22x22xf32, #tpu.memory_space<vmem>>, vector<1x16x16xf32>
    %335 = vector.broadcast %332 : f32 to vector<1x16x16xf32>
    %336 = arith.mulf %335, %334 : vector<1x16x16xf32>
    %337 = arith.addf %331, %336 : vector<1x16x16xf32>
    %c0_315 = arith.constant 0 : index
    %c4_316 = arith.constant 4 : index
    %c4_317 = arith.constant 4 : index
    %338 = vector.load %arg5[%c0_315, %c4_316, %c4_317] : memref<1x22x22xf32, #tpu.memory_space<vmem>>, vector<1x16x16xf32>
    %339 = vector.broadcast %333 : f32 to vector<1x16x16xf32>
    %340 = arith.mulf %339, %338 : vector<1x16x16xf32>
    %341 = arith.addf %337, %340 : vector<1x16x16xf32>
    %c0_318 = arith.constant 0 : index
    %c33 = arith.constant 33 : index
    %342 = memref.load %arg1[%c0_318, %c33] : memref<2x49xf32, #tpu.memory_space<smem>>
    %c1_319 = arith.constant 1 : index
    %c33_320 = arith.constant 33 : index
    %343 = memref.load %arg1[%c1_319, %c33_320] : memref<2x49xf32, #tpu.memory_space<smem>>
    %c0_321 = arith.constant 0 : index
    %c4_322 = arith.constant 4 : index
    %c5_323 = arith.constant 5 : index
    %344 = vector.load %arg4[%c0_321, %c4_322, %c5_323] : memref<1x22x22xf32, #tpu.memory_space<vmem>>, vector<1x16x16xf32>
    %345 = vector.broadcast %342 : f32 to vector<1x16x16xf32>
    %346 = arith.mulf %345, %344 : vector<1x16x16xf32>
    %347 = arith.addf %341, %346 : vector<1x16x16xf32>
    %c0_324 = arith.constant 0 : index
    %c4_325 = arith.constant 4 : index
    %c5_326 = arith.constant 5 : index
    %348 = vector.load %arg5[%c0_324, %c4_325, %c5_326] : memref<1x22x22xf32, #tpu.memory_space<vmem>>, vector<1x16x16xf32>
    %349 = vector.broadcast %343 : f32 to vector<1x16x16xf32>
    %350 = arith.mulf %349, %348 : vector<1x16x16xf32>
    %351 = arith.addf %347, %350 : vector<1x16x16xf32>
    %c0_327 = arith.constant 0 : index
    %c34 = arith.constant 34 : index
    %352 = memref.load %arg1[%c0_327, %c34] : memref<2x49xf32, #tpu.memory_space<smem>>
    %c1_328 = arith.constant 1 : index
    %c34_329 = arith.constant 34 : index
    %353 = memref.load %arg1[%c1_328, %c34_329] : memref<2x49xf32, #tpu.memory_space<smem>>
    %c0_330 = arith.constant 0 : index
    %c4_331 = arith.constant 4 : index
    %c6_332 = arith.constant 6 : index
    %354 = vector.load %arg4[%c0_330, %c4_331, %c6_332] : memref<1x22x22xf32, #tpu.memory_space<vmem>>, vector<1x16x16xf32>
    %355 = vector.broadcast %352 : f32 to vector<1x16x16xf32>
    %356 = arith.mulf %355, %354 : vector<1x16x16xf32>
    %357 = arith.addf %351, %356 : vector<1x16x16xf32>
    %c0_333 = arith.constant 0 : index
    %c4_334 = arith.constant 4 : index
    %c6_335 = arith.constant 6 : index
    %358 = vector.load %arg5[%c0_333, %c4_334, %c6_335] : memref<1x22x22xf32, #tpu.memory_space<vmem>>, vector<1x16x16xf32>
    %359 = vector.broadcast %353 : f32 to vector<1x16x16xf32>
    %360 = arith.mulf %359, %358 : vector<1x16x16xf32>
    %361 = arith.addf %357, %360 : vector<1x16x16xf32>
    %c0_336 = arith.constant 0 : index
    %c35 = arith.constant 35 : index
    %362 = memref.load %arg1[%c0_336, %c35] : memref<2x49xf32, #tpu.memory_space<smem>>
    %c1_337 = arith.constant 1 : index
    %c35_338 = arith.constant 35 : index
    %363 = memref.load %arg1[%c1_337, %c35_338] : memref<2x49xf32, #tpu.memory_space<smem>>
    %c0_339 = arith.constant 0 : index
    %c5_340 = arith.constant 5 : index
    %c0_341 = arith.constant 0 : index
    %364 = vector.load %arg4[%c0_339, %c5_340, %c0_341] : memref<1x22x22xf32, #tpu.memory_space<vmem>>, vector<1x16x16xf32>
    %365 = vector.broadcast %362 : f32 to vector<1x16x16xf32>
    %366 = arith.mulf %365, %364 : vector<1x16x16xf32>
    %367 = arith.addf %361, %366 : vector<1x16x16xf32>
    %c0_342 = arith.constant 0 : index
    %c5_343 = arith.constant 5 : index
    %c0_344 = arith.constant 0 : index
    %368 = vector.load %arg5[%c0_342, %c5_343, %c0_344] : memref<1x22x22xf32, #tpu.memory_space<vmem>>, vector<1x16x16xf32>
    %369 = vector.broadcast %363 : f32 to vector<1x16x16xf32>
    %370 = arith.mulf %369, %368 : vector<1x16x16xf32>
    %371 = arith.addf %367, %370 : vector<1x16x16xf32>
    %c0_345 = arith.constant 0 : index
    %c36 = arith.constant 36 : index
    %372 = memref.load %arg1[%c0_345, %c36] : memref<2x49xf32, #tpu.memory_space<smem>>
    %c1_346 = arith.constant 1 : index
    %c36_347 = arith.constant 36 : index
    %373 = memref.load %arg1[%c1_346, %c36_347] : memref<2x49xf32, #tpu.memory_space<smem>>
    %c0_348 = arith.constant 0 : index
    %c5_349 = arith.constant 5 : index
    %c1_350 = arith.constant 1 : index
    %374 = vector.load %arg4[%c0_348, %c5_349, %c1_350] : memref<1x22x22xf32, #tpu.memory_space<vmem>>, vector<1x16x16xf32>
    %375 = vector.broadcast %372 : f32 to vector<1x16x16xf32>
    %376 = arith.mulf %375, %374 : vector<1x16x16xf32>
    %377 = arith.addf %371, %376 : vector<1x16x16xf32>
    %c0_351 = arith.constant 0 : index
    %c5_352 = arith.constant 5 : index
    %c1_353 = arith.constant 1 : index
    %378 = vector.load %arg5[%c0_351, %c5_352, %c1_353] : memref<1x22x22xf32, #tpu.memory_space<vmem>>, vector<1x16x16xf32>
    %379 = vector.broadcast %373 : f32 to vector<1x16x16xf32>
    %380 = arith.mulf %379, %378 : vector<1x16x16xf32>
    %381 = arith.addf %377, %380 : vector<1x16x16xf32>
    %c0_354 = arith.constant 0 : index
    %c37 = arith.constant 37 : index
    %382 = memref.load %arg1[%c0_354, %c37] : memref<2x49xf32, #tpu.memory_space<smem>>
    %c1_355 = arith.constant 1 : index
    %c37_356 = arith.constant 37 : index
    %383 = memref.load %arg1[%c1_355, %c37_356] : memref<2x49xf32, #tpu.memory_space<smem>>
    %c0_357 = arith.constant 0 : index
    %c5_358 = arith.constant 5 : index
    %c2_359 = arith.constant 2 : index
    %384 = vector.load %arg4[%c0_357, %c5_358, %c2_359] : memref<1x22x22xf32, #tpu.memory_space<vmem>>, vector<1x16x16xf32>
    %385 = vector.broadcast %382 : f32 to vector<1x16x16xf32>
    %386 = arith.mulf %385, %384 : vector<1x16x16xf32>
    %387 = arith.addf %381, %386 : vector<1x16x16xf32>
    %c0_360 = arith.constant 0 : index
    %c5_361 = arith.constant 5 : index
    %c2_362 = arith.constant 2 : index
    %388 = vector.load %arg5[%c0_360, %c5_361, %c2_362] : memref<1x22x22xf32, #tpu.memory_space<vmem>>, vector<1x16x16xf32>
    %389 = vector.broadcast %383 : f32 to vector<1x16x16xf32>
    %390 = arith.mulf %389, %388 : vector<1x16x16xf32>
    %391 = arith.addf %387, %390 : vector<1x16x16xf32>
    %c0_363 = arith.constant 0 : index
    %c38 = arith.constant 38 : index
    %392 = memref.load %arg1[%c0_363, %c38] : memref<2x49xf32, #tpu.memory_space<smem>>
    %c1_364 = arith.constant 1 : index
    %c38_365 = arith.constant 38 : index
    %393 = memref.load %arg1[%c1_364, %c38_365] : memref<2x49xf32, #tpu.memory_space<smem>>
    %c0_366 = arith.constant 0 : index
    %c5_367 = arith.constant 5 : index
    %c3_368 = arith.constant 3 : index
    %394 = vector.load %arg4[%c0_366, %c5_367, %c3_368] : memref<1x22x22xf32, #tpu.memory_space<vmem>>, vector<1x16x16xf32>
    %395 = vector.broadcast %392 : f32 to vector<1x16x16xf32>
    %396 = arith.mulf %395, %394 : vector<1x16x16xf32>
    %397 = arith.addf %391, %396 : vector<1x16x16xf32>
    %c0_369 = arith.constant 0 : index
    %c5_370 = arith.constant 5 : index
    %c3_371 = arith.constant 3 : index
    %398 = vector.load %arg5[%c0_369, %c5_370, %c3_371] : memref<1x22x22xf32, #tpu.memory_space<vmem>>, vector<1x16x16xf32>
    %399 = vector.broadcast %393 : f32 to vector<1x16x16xf32>
    %400 = arith.mulf %399, %398 : vector<1x16x16xf32>
    %401 = arith.addf %397, %400 : vector<1x16x16xf32>
    %c0_372 = arith.constant 0 : index
    %c39 = arith.constant 39 : index
    %402 = memref.load %arg1[%c0_372, %c39] : memref<2x49xf32, #tpu.memory_space<smem>>
    %c1_373 = arith.constant 1 : index
    %c39_374 = arith.constant 39 : index
    %403 = memref.load %arg1[%c1_373, %c39_374] : memref<2x49xf32, #tpu.memory_space<smem>>
    %c0_375 = arith.constant 0 : index
    %c5_376 = arith.constant 5 : index
    %c4_377 = arith.constant 4 : index
    %404 = vector.load %arg4[%c0_375, %c5_376, %c4_377] : memref<1x22x22xf32, #tpu.memory_space<vmem>>, vector<1x16x16xf32>
    %405 = vector.broadcast %402 : f32 to vector<1x16x16xf32>
    %406 = arith.mulf %405, %404 : vector<1x16x16xf32>
    %407 = arith.addf %401, %406 : vector<1x16x16xf32>
    %c0_378 = arith.constant 0 : index
    %c5_379 = arith.constant 5 : index
    %c4_380 = arith.constant 4 : index
    %408 = vector.load %arg5[%c0_378, %c5_379, %c4_380] : memref<1x22x22xf32, #tpu.memory_space<vmem>>, vector<1x16x16xf32>
    %409 = vector.broadcast %403 : f32 to vector<1x16x16xf32>
    %410 = arith.mulf %409, %408 : vector<1x16x16xf32>
    %411 = arith.addf %407, %410 : vector<1x16x16xf32>
    %c0_381 = arith.constant 0 : index
    %c40 = arith.constant 40 : index
    %412 = memref.load %arg1[%c0_381, %c40] : memref<2x49xf32, #tpu.memory_space<smem>>
    %c1_382 = arith.constant 1 : index
    %c40_383 = arith.constant 40 : index
    %413 = memref.load %arg1[%c1_382, %c40_383] : memref<2x49xf32, #tpu.memory_space<smem>>
    %c0_384 = arith.constant 0 : index
    %c5_385 = arith.constant 5 : index
    %c5_386 = arith.constant 5 : index
    %414 = vector.load %arg4[%c0_384, %c5_385, %c5_386] : memref<1x22x22xf32, #tpu.memory_space<vmem>>, vector<1x16x16xf32>
    %415 = vector.broadcast %412 : f32 to vector<1x16x16xf32>
    %416 = arith.mulf %415, %414 : vector<1x16x16xf32>
    %417 = arith.addf %411, %416 : vector<1x16x16xf32>
    %c0_387 = arith.constant 0 : index
    %c5_388 = arith.constant 5 : index
    %c5_389 = arith.constant 5 : index
    %418 = vector.load %arg5[%c0_387, %c5_388, %c5_389] : memref<1x22x22xf32, #tpu.memory_space<vmem>>, vector<1x16x16xf32>
    %419 = vector.broadcast %413 : f32 to vector<1x16x16xf32>
    %420 = arith.mulf %419, %418 : vector<1x16x16xf32>
    %421 = arith.addf %417, %420 : vector<1x16x16xf32>
    %c0_390 = arith.constant 0 : index
    %c41 = arith.constant 41 : index
    %422 = memref.load %arg1[%c0_390, %c41] : memref<2x49xf32, #tpu.memory_space<smem>>
    %c1_391 = arith.constant 1 : index
    %c41_392 = arith.constant 41 : index
    %423 = memref.load %arg1[%c1_391, %c41_392] : memref<2x49xf32, #tpu.memory_space<smem>>
    %c0_393 = arith.constant 0 : index
    %c5_394 = arith.constant 5 : index
    %c6_395 = arith.constant 6 : index
    %424 = vector.load %arg4[%c0_393, %c5_394, %c6_395] : memref<1x22x22xf32, #tpu.memory_space<vmem>>, vector<1x16x16xf32>
    %425 = vector.broadcast %422 : f32 to vector<1x16x16xf32>
    %426 = arith.mulf %425, %424 : vector<1x16x16xf32>
    %427 = arith.addf %421, %426 : vector<1x16x16xf32>
    %c0_396 = arith.constant 0 : index
    %c5_397 = arith.constant 5 : index
    %c6_398 = arith.constant 6 : index
    %428 = vector.load %arg5[%c0_396, %c5_397, %c6_398] : memref<1x22x22xf32, #tpu.memory_space<vmem>>, vector<1x16x16xf32>
    %429 = vector.broadcast %423 : f32 to vector<1x16x16xf32>
    %430 = arith.mulf %429, %428 : vector<1x16x16xf32>
    %431 = arith.addf %427, %430 : vector<1x16x16xf32>
    %c0_399 = arith.constant 0 : index
    %c42 = arith.constant 42 : index
    %432 = memref.load %arg1[%c0_399, %c42] : memref<2x49xf32, #tpu.memory_space<smem>>
    %c1_400 = arith.constant 1 : index
    %c42_401 = arith.constant 42 : index
    %433 = memref.load %arg1[%c1_400, %c42_401] : memref<2x49xf32, #tpu.memory_space<smem>>
    %c0_402 = arith.constant 0 : index
    %c6_403 = arith.constant 6 : index
    %c0_404 = arith.constant 0 : index
    %434 = vector.load %arg4[%c0_402, %c6_403, %c0_404] : memref<1x22x22xf32, #tpu.memory_space<vmem>>, vector<1x16x16xf32>
    %435 = vector.broadcast %432 : f32 to vector<1x16x16xf32>
    %436 = arith.mulf %435, %434 : vector<1x16x16xf32>
    %437 = arith.addf %431, %436 : vector<1x16x16xf32>
    %c0_405 = arith.constant 0 : index
    %c6_406 = arith.constant 6 : index
    %c0_407 = arith.constant 0 : index
    %438 = vector.load %arg5[%c0_405, %c6_406, %c0_407] : memref<1x22x22xf32, #tpu.memory_space<vmem>>, vector<1x16x16xf32>
    %439 = vector.broadcast %433 : f32 to vector<1x16x16xf32>
    %440 = arith.mulf %439, %438 : vector<1x16x16xf32>
    %441 = arith.addf %437, %440 : vector<1x16x16xf32>
    %c0_408 = arith.constant 0 : index
    %c43 = arith.constant 43 : index
    %442 = memref.load %arg1[%c0_408, %c43] : memref<2x49xf32, #tpu.memory_space<smem>>
    %c1_409 = arith.constant 1 : index
    %c43_410 = arith.constant 43 : index
    %443 = memref.load %arg1[%c1_409, %c43_410] : memref<2x49xf32, #tpu.memory_space<smem>>
    %c0_411 = arith.constant 0 : index
    %c6_412 = arith.constant 6 : index
    %c1_413 = arith.constant 1 : index
    %444 = vector.load %arg4[%c0_411, %c6_412, %c1_413] : memref<1x22x22xf32, #tpu.memory_space<vmem>>, vector<1x16x16xf32>
    %445 = vector.broadcast %442 : f32 to vector<1x16x16xf32>
    %446 = arith.mulf %445, %444 : vector<1x16x16xf32>
    %447 = arith.addf %441, %446 : vector<1x16x16xf32>
    %c0_414 = arith.constant 0 : index
    %c6_415 = arith.constant 6 : index
    %c1_416 = arith.constant 1 : index
    %448 = vector.load %arg5[%c0_414, %c6_415, %c1_416] : memref<1x22x22xf32, #tpu.memory_space<vmem>>, vector<1x16x16xf32>
    %449 = vector.broadcast %443 : f32 to vector<1x16x16xf32>
    %450 = arith.mulf %449, %448 : vector<1x16x16xf32>
    %451 = arith.addf %447, %450 : vector<1x16x16xf32>
    %c0_417 = arith.constant 0 : index
    %c44 = arith.constant 44 : index
    %452 = memref.load %arg1[%c0_417, %c44] : memref<2x49xf32, #tpu.memory_space<smem>>
    %c1_418 = arith.constant 1 : index
    %c44_419 = arith.constant 44 : index
    %453 = memref.load %arg1[%c1_418, %c44_419] : memref<2x49xf32, #tpu.memory_space<smem>>
    %c0_420 = arith.constant 0 : index
    %c6_421 = arith.constant 6 : index
    %c2_422 = arith.constant 2 : index
    %454 = vector.load %arg4[%c0_420, %c6_421, %c2_422] : memref<1x22x22xf32, #tpu.memory_space<vmem>>, vector<1x16x16xf32>
    %455 = vector.broadcast %452 : f32 to vector<1x16x16xf32>
    %456 = arith.mulf %455, %454 : vector<1x16x16xf32>
    %457 = arith.addf %451, %456 : vector<1x16x16xf32>
    %c0_423 = arith.constant 0 : index
    %c6_424 = arith.constant 6 : index
    %c2_425 = arith.constant 2 : index
    %458 = vector.load %arg5[%c0_423, %c6_424, %c2_425] : memref<1x22x22xf32, #tpu.memory_space<vmem>>, vector<1x16x16xf32>
    %459 = vector.broadcast %453 : f32 to vector<1x16x16xf32>
    %460 = arith.mulf %459, %458 : vector<1x16x16xf32>
    %461 = arith.addf %457, %460 : vector<1x16x16xf32>
    %c0_426 = arith.constant 0 : index
    %c45 = arith.constant 45 : index
    %462 = memref.load %arg1[%c0_426, %c45] : memref<2x49xf32, #tpu.memory_space<smem>>
    %c1_427 = arith.constant 1 : index
    %c45_428 = arith.constant 45 : index
    %463 = memref.load %arg1[%c1_427, %c45_428] : memref<2x49xf32, #tpu.memory_space<smem>>
    %c0_429 = arith.constant 0 : index
    %c6_430 = arith.constant 6 : index
    %c3_431 = arith.constant 3 : index
    %464 = vector.load %arg4[%c0_429, %c6_430, %c3_431] : memref<1x22x22xf32, #tpu.memory_space<vmem>>, vector<1x16x16xf32>
    %465 = vector.broadcast %462 : f32 to vector<1x16x16xf32>
    %466 = arith.mulf %465, %464 : vector<1x16x16xf32>
    %467 = arith.addf %461, %466 : vector<1x16x16xf32>
    %c0_432 = arith.constant 0 : index
    %c6_433 = arith.constant 6 : index
    %c3_434 = arith.constant 3 : index
    %468 = vector.load %arg5[%c0_432, %c6_433, %c3_434] : memref<1x22x22xf32, #tpu.memory_space<vmem>>, vector<1x16x16xf32>
    %469 = vector.broadcast %463 : f32 to vector<1x16x16xf32>
    %470 = arith.mulf %469, %468 : vector<1x16x16xf32>
    %471 = arith.addf %467, %470 : vector<1x16x16xf32>
    %c0_435 = arith.constant 0 : index
    %c46 = arith.constant 46 : index
    %472 = memref.load %arg1[%c0_435, %c46] : memref<2x49xf32, #tpu.memory_space<smem>>
    %c1_436 = arith.constant 1 : index
    %c46_437 = arith.constant 46 : index
    %473 = memref.load %arg1[%c1_436, %c46_437] : memref<2x49xf32, #tpu.memory_space<smem>>
    %c0_438 = arith.constant 0 : index
    %c6_439 = arith.constant 6 : index
    %c4_440 = arith.constant 4 : index
    %474 = vector.load %arg4[%c0_438, %c6_439, %c4_440] : memref<1x22x22xf32, #tpu.memory_space<vmem>>, vector<1x16x16xf32>
    %475 = vector.broadcast %472 : f32 to vector<1x16x16xf32>
    %476 = arith.mulf %475, %474 : vector<1x16x16xf32>
    %477 = arith.addf %471, %476 : vector<1x16x16xf32>
    %c0_441 = arith.constant 0 : index
    %c6_442 = arith.constant 6 : index
    %c4_443 = arith.constant 4 : index
    %478 = vector.load %arg5[%c0_441, %c6_442, %c4_443] : memref<1x22x22xf32, #tpu.memory_space<vmem>>, vector<1x16x16xf32>
    %479 = vector.broadcast %473 : f32 to vector<1x16x16xf32>
    %480 = arith.mulf %479, %478 : vector<1x16x16xf32>
    %481 = arith.addf %477, %480 : vector<1x16x16xf32>
    %c0_444 = arith.constant 0 : index
    %c47 = arith.constant 47 : index
    %482 = memref.load %arg1[%c0_444, %c47] : memref<2x49xf32, #tpu.memory_space<smem>>
    %c1_445 = arith.constant 1 : index
    %c47_446 = arith.constant 47 : index
    %483 = memref.load %arg1[%c1_445, %c47_446] : memref<2x49xf32, #tpu.memory_space<smem>>
    %c0_447 = arith.constant 0 : index
    %c6_448 = arith.constant 6 : index
    %c5_449 = arith.constant 5 : index
    %484 = vector.load %arg4[%c0_447, %c6_448, %c5_449] : memref<1x22x22xf32, #tpu.memory_space<vmem>>, vector<1x16x16xf32>
    %485 = vector.broadcast %482 : f32 to vector<1x16x16xf32>
    %486 = arith.mulf %485, %484 : vector<1x16x16xf32>
    %487 = arith.addf %481, %486 : vector<1x16x16xf32>
    %c0_450 = arith.constant 0 : index
    %c6_451 = arith.constant 6 : index
    %c5_452 = arith.constant 5 : index
    %488 = vector.load %arg5[%c0_450, %c6_451, %c5_452] : memref<1x22x22xf32, #tpu.memory_space<vmem>>, vector<1x16x16xf32>
    %489 = vector.broadcast %483 : f32 to vector<1x16x16xf32>
    %490 = arith.mulf %489, %488 : vector<1x16x16xf32>
    %491 = arith.addf %487, %490 : vector<1x16x16xf32>
    %c0_453 = arith.constant 0 : index
    %c48 = arith.constant 48 : index
    %492 = memref.load %arg1[%c0_453, %c48] : memref<2x49xf32, #tpu.memory_space<smem>>
    %c1_454 = arith.constant 1 : index
    %c48_455 = arith.constant 48 : index
    %493 = memref.load %arg1[%c1_454, %c48_455] : memref<2x49xf32, #tpu.memory_space<smem>>
    %c0_456 = arith.constant 0 : index
    %c6_457 = arith.constant 6 : index
    %c6_458 = arith.constant 6 : index
    %494 = vector.load %arg4[%c0_456, %c6_457, %c6_458] : memref<1x22x22xf32, #tpu.memory_space<vmem>>, vector<1x16x16xf32>
    %495 = vector.broadcast %492 : f32 to vector<1x16x16xf32>
    %496 = arith.mulf %495, %494 : vector<1x16x16xf32>
    %497 = arith.addf %491, %496 : vector<1x16x16xf32>
    %c0_459 = arith.constant 0 : index
    %c6_460 = arith.constant 6 : index
    %c6_461 = arith.constant 6 : index
    %498 = vector.load %arg5[%c0_459, %c6_460, %c6_461] : memref<1x22x22xf32, #tpu.memory_space<vmem>>, vector<1x16x16xf32>
    %499 = vector.broadcast %493 : f32 to vector<1x16x16xf32>
    %500 = arith.mulf %499, %498 : vector<1x16x16xf32>
    %501 = arith.addf %497, %500 : vector<1x16x16xf32>
    %502 = arith.negf %501 : vector<1x16x16xf32>
    %503 = math.exp %502 : vector<1x16x16xf32>
    %cst_462 = arith.constant 1.000000e+00 : f32
    %504 = vector.broadcast %cst_462 : f32 to vector<1x16x16xf32>
    %505 = arith.addf %504, %503 : vector<1x16x16xf32>
    %506 = arith.divf %504, %505 : vector<1x16x16xf32>
    %c0_463 = arith.constant 0 : index
    %c0_464 = arith.constant 0 : index
    %c0_465 = arith.constant 0 : index
    %507 = vector.load %arg3[%c0_463, %c0_464, %c0_465] : memref<1x16x16xf32, #tpu.memory_space<vmem>>, vector<1x16x16xf32>
    tpu.vector_store %arg3[%c0_463, %c0_464, %c0_465], %506 {strides = array<i32>} : memref<1x16x16xf32, #tpu.memory_space<vmem>>, vector<1x16x16xf32>,
    return
  }
  func.func @transform_0(%arg0: i32, %arg1: memref<2x49xf32, #tpu.memory_space<smem>>) -> (i32, i32, i32, i32) {
    %c0_i32 = arith.constant 0 : i32
    %c0_i32_0 = arith.constant 0 : i32
    %c0_i32_1 = arith.constant 0 : i32
    %c0_i32_2 = arith.constant 0 : i32
    return %arg0, %c0_i32, %c0_i32_0, %c0_i32_1 : i32, i32, i32, i32
  }
  func.func @transform_1(%arg0: i32, %arg1: memref<2x49xf32, #tpu.memory_space<smem>>) -> (i32, i32, i32) {
    %c0_i32 = arith.constant 0 : i32
    %c0_i32_0 = arith.constant 0 : i32
    %c0_i32_1 = arith.constant 0 : i32
    return %arg0, %c0_i32, %c0_i32_0 : i32, i32, i32
  }
}

</mosaic_0001>

<bundles_post_ra>
// kernel: tpu_custom_call.1
= control target key start
LH: loop header
LB: loop body
LE: loop exit
PB: predicated region body
PF: predicated region fallthrough
CT: control target
= control target key end

     0   :  { %s1925_s12 = smov [#allocation5]   ;;  %s2808_s0 = inlined_call_operand.hbm [shape: f32[2,49], index: 0, kind: input, shape index: {}]   ;;  %s2809_s1 = inlined_call_operand.hbm [shape: f32[2,4,16,16], index: 1, kind: input, shape index: {}]   ;;  %s2810_s2 = inlined_call_operand.hbm [shape: f32[2,16,16], index: 2, kind: output, shape index: {}]  }
   0x1   :  { %s8_s11 = sshll.u32 %s2808_s0, 4  ;;  %s9_s11 = int_to_ptr.hbm [resolvable:$true] %s8_s11 }
   0x2   :  { %11 = dma.hbm_to_smem %s9_s11, 32, %s1925_s12, [#allocation4] }
   0x3   :  { %1899 = dma.done.wait [#allocation4], 32 }
   0x4   :  { %1900 = vsyncadd [#allocation4], 4294967264 }
   0x5   :  { %14 = sfence }
   0x6   :  { %15 = vsyncpa [#allocation7], 0 }
   0x7   :  { %17 = vsyncpa [#allocation7 + $0x1], 0 }
   0x8   :  { %18 = vsyncpa [#allocation8], 0 }
   0x9   :  { %20 = vsyncpa [#allocation8 + $0x1], 0  ;;  %s1956_s13 = smov 0   ;;  %s1958_s14 = smov 0  }
   0xa   :  { %s1960_s15 = smov 0   ;;  %s1962_s16 = smov 0  }
   0xb LB: > { %s1977_s0 = sadd.s32 4294967295, %s1923_s16   ;;  %s1631_s17 = sadd.s32 4294967294, %s1923_s16   ;;  %s1923_s16 = sphi %s1962_s16, %s2820_s16   ;;  %s1919_s15 = sphi %s1960_s15, %s2819_s15   ;;  %s1915_s14 = sphi %s1958_s14, %s2818_s14   ;;  %s1911_s13 = sphi %s1956_s13, %s2817_s13  }
   0xc   : > { %s1981_s18 = sadd.s32 1, %s1923_s16   ;;  %s33_s19 = sadd.s32 1, %s1919_s15 }
   0xd   : > { %s30_s20 = ssub.s32 %s1923_s16, %s1981_s18  ;;  %p40_p0 = scmp.ne.s32.totalorder %s1919_s15, %s1915_s14 }
   0xe   : > { %p31_p1 = scmp.eq.s32.totalorder %s30_s20, 0  ;;  %p41_p2 = scmp.eq.s32.totalorder %s1923_s16, 0 }
   0xf   : > { %p46_p3 = scmp.ne.s32.totalorder %s1915_s14, %s1911_s13  ;;  %p47_p4 = scmp.eq.s32.totalorder %s1977_s0, 0 }
  0x10   : > { %s1993_s21 = scalar_select %p31_p1, %s1919_s15, %s33_s19  }
  0x11   : > { %p1995_p5 = por %p41_p2, %p40_p0  ;;  %p1999_p6 = por %p47_p4, %p46_p3 }
  0x12   : > { %p70_p7 = scmp.eq.s32.totalorder %s1977_s0, 1  ;;  %p76_p8 = scmp.eq.s32.totalorder %s1631_s17, 1 }
  0x13   : > { %p1758_p10 = scmp.lt.s32.totalorder %s1923_s16, 2  ;;  %s96_s26 = sand.u32 1, %s1919_s15  }
  0x14   : > { %p2006_p11 = por %p70_p7, %p40_p0  ;;  %p2010_p12 = por %p76_p8, %p46_p3 }
  0x15   : > { %s1744_s27 = sshll.u32 %s1923_s16, 6  ;;  %s1634_s28 = sshll.u32 %s96_s26, 6 }
  0x16   : > { %s105_s3 = scalar_lea.hbm %s2809_s1, %s1744_s27  ;;  %s100_s5 = scalar_lea.vmem [#allocation6], %s1634_s28 }
  0x17   : > { %s106_s4 = sshll.u32 %s105_s3, 4  ;;  %s108_s6 = sshll.u32 %s100_s5, 4  ;;  %s107_s4 = int_to_ptr.hbm [resolvable:$true] %s106_s4  ;;  %s109_s6 = int_to_ptr.vmem [resolvable:$true] %s108_s6 }
  0x18   : > { %p2021_p13 = pnand %p1758_p10, %p1995_p5  ;;  %p1637_p0 = scmp.ge.s32.totalorder %s1923_s16, 1 }
  0x19   : > { %p116_p1 = scmp.lt.s32.totalorder %s1923_s16, 3  ;;  %s97_s8 = scalar_lea.sflag [#allocation7], %s96_s26 }
  0x1a   : > { %s1825_s9 = sshra.s32 %s107_s4, 4  ;;  %p1829_p3 = pneg %p2021_p13  ;;  %s1826_s9 = int_to_ptr.hbm [resolvable:$true] %s1825_s9 }
  0x1b   : > { %s1827_s10 = scalar_lea.hbm %s1826_s9, 64  ;;  %s1832_s17 = scalar_lea.hbm %s2809_s1, 128 }
  0x1c   : > { %p1828_p2 = scmp.ne.s32.totalorder %s1826_s9, %s1827_s10  ;;  %p1833_p5 = scmp.lt.s32.totalorder %s1826_s9, %s2809_s1 }
  0x1d   : > { %p1834_p8 = scmp.lt.s32.totalorder %s1832_s17, %s1827_s10 }
  0x1e   : > { %p1830_p4 = pnand %p1829_p3, %p1828_p2 }
  0x1f   : > { %p1835_p10 = por %p1834_p8, %p1833_p5 }
  0x20   : > { %p1831_p7 = pneg %p1830_p4 }
  0x22   : > { %p1836_p9 = pnand %p1835_p10, %p1831_p7 }
  0x24   : > { %1839 = shalt.err (!%p1836_p9)
}
  0x25   : > { %s1926_s22 = smov 128   ;;  %s1927_s26 = smov 8  }
  0x26   : > { %1753 = dma.hbm_to_vmem [thread:$0]  (!%p2021_p13), %s107_s4, 1024, %s109_s6, %s97_s8, %s1926_s22, %s1926_s22, %s1927_s26  }
  0x27   : > { %p117_p2 = pnand %p1637_p0, %p116_p1 }
  0x28   : > { %s2042_s27 = sand.u32 (!%p117_p2), 1, %s1915_s14  }
  0x29   : > { %120 = sbr.rel (%p117_p2) target bundleno = 770 (0x302), region = 24  ;;  %s1638_s28 = sshll.u32 (!%p117_p2), %s2042_s27, 6 }
  0x2a   : > { %s123_s29 = scalar_lea.sflag (!%p117_p2), [#allocation7], %s2042_s27  ;;  %s126_s30 = scalar_lea.vmem (!%p117_p2), [#allocation6], %s1638_s28 }
  0x2e   : > { %1902 = dma.done.wait (%p1999_p6), %s123_s29, 1024  }
  0x2f   : > { %1904 = vsyncadd (%p1999_p6), %s123_s29, 4294966272  ;;  %vm185_vm0 = vcmask 179200   ;;  %v1928_v0 = vmov 0.0   ;;  %vm154_vm1 = vcmask 130048   ;;  %v146_v1 = vld [vmem:[%s126_s30] sm:$0xff]  ;;  %v148_v2 = vld [vmem:[%s126_s30 + $0x10] sm:$0xff] }
  0x30   : > { %190 = vst.msk [vmem:[#allocation3] sm:$0xff] %vm185_vm0, %v1928_v0  ;;  %v150_v3 = vld [vmem:[%s126_s30 + $0x20] sm:$0xff]  ;;  %v152_v4 = vld [vmem:[%s126_s30 + $0x30] sm:$0xff]  ;;  %v156_v5 = vsel %vm154_vm1, %v148_v2, 0.0  ;;  %v171_v6 = vsel %vm154_vm1, %v146_v1, -inf  ;;  %v172_v7 = vsel %vm154_vm1, %v148_v2, -inf }
  0x31   : > { %191 = vst.msk [vmem:[#allocation3 + $0x8] sm:$0xff] %vm185_vm0, %v1928_v0  ;;  %v173_v8 = vsel %vm154_vm1, %v150_v3, -inf  ;;  %v147_v9 = vld [vmem:[%s126_s30 + $0x8] sm:$0xff]  ;;  %v175_v11 = vsel %vm154_vm1, %v152_v4, -inf  ;;  %v155_v12 = vsel %vm154_vm1, %v146_v1, 0.0  ;;  %v158_v13 = vsel %vm154_vm1, %v150_v3, 0.0 }
  0x32   : > { %186 = vst.msk [vmem:[#allocation2] sm:$0xff] %vm185_vm0, %v1928_v0  ;;  %v174_v10 = vmax.f32 %v171_v6, %v173_v8  ;;  %v149_v14 = vld [vmem:[%s126_s30 + $0x18] sm:$0xff]  ;;  %v151_v15 = vld [vmem:[%s126_s30 + $0x28] sm:$0xff]  ;;  %v176_v17 = vmax.f32 %v172_v7, %v175_v11  ;;  %v157_v18 = vadd.f32 %v156_v5, %v155_v12  ;;  %v160_v19 = vsel %vm154_vm1, %v152_v4, 0.0  ;;  %s1929_s23 = smov 3   ;;  %s1642_s3 = sld [smem:[#allocation5 + $0x81]] }
  0x33   : > { %187 = vst.msk [vmem:[#allocation2 + $0x8] sm:$0xff] %vm185_vm0, %v1928_v0  ;;  %v153_v16 = vld [vmem:[%s126_s30 + $0x38] sm:$0xff]  ;;  %v162_v20 = vsel %vm154_vm1, %v147_v9, 0.0  ;;  %v163_v21 = vsel %vm154_vm1, %v149_v14, 0.0  ;;  %v178_v22 = vsel %vm154_vm1, %v147_v9, -inf  ;;  %v179_v23 = vsel %vm154_vm1, %v149_v14, -inf }
  0x34   : > { %v180_v24 = vsel %vm154_vm1, %v151_v15, -inf  ;;  %v177_v25 = vmax.f32 %v174_v10, %v176_v17  ;;  %v159_v26 = vadd.f32 %v158_v13, %v157_v18  ;;  %v182_v27 = vsel %vm154_vm1, %v153_v16, -inf  ;;  %s2066_s4 = sld [smem:[#allocation5 + $0x80]]  ;;  %s1930_s8 = smov 127  }
  0x35   : > { %v164_v28 = vadd.f32 %v163_v21, %v162_v20  ;;  %v165_v29 = vsel %vm154_vm1, %v151_v15, 0.0  ;;  %v181_v31 = vmax.f32 %v178_v22, %v180_v24  ;;  %v183_v32 = vmax.f32 %v179_v23, %v182_v27  ;;  %s2069_s5 = sld [smem:[#allocation5]]  ;;  %s1931_s10 = smov 126  }
  0x36   : > { %206 = vrot.lane.b32.xlu1 %v177_v25, %s1929_s23  ;;  %v161_v30 = vadd.f32 %v160_v19, %v159_v26  ;;  %v167_v34 = vsel %vm154_vm1, %v153_v16, 0.0  ;;  %vm188_vm2 = vcmask 177152   ;;  %vm201_vm3 = vcmask 154648   ;;  %s2072_s6 = sld [smem:[#allocation5 + $0x82]]  ;;  %s1932_s11 = smov 125  }
  0x37   : > { %v166_v33 = vadd.f32 %v165_v29, %v164_v28  ;;  %v184_v36 = vmax.f32 %v181_v31, %v183_v32  ;;  %192 = vst.msk [vmem:[#allocation3 + $0x10] sm:$0x3f] %vm188_vm2, %v1928_v0  ;;  %s1646_s7 = sld [smem:[#allocation5 + $0x83]]  ;;  %s1933_s19 = smov 124  }
  0x38   : > { %v169_v35 = vmul.f32 0.25, %v161_v30  ;;  %189 = vst.msk [vmem:[#allocation2 + $0x10] sm:$0x3f] %vm188_vm2, %v1928_v0  ;;  %v245_v41 = vstv %s1642_s3  ;;  %s1648_s9 = sld [smem:[#allocation5 + $0x84]]  ;;  %s1934_s22 = smov 123  }
  0x39   : > { %v168_v37 = vadd.f32 %v167_v34, %v166_v33  ;;  %s1650_s12 = sld [smem:[#allocation5 + $0x85]]  ;;  %s1935_s26 = smov 122  }
  0x3a   : > { %195 = vrot.lane.b32.xlu0 %v169_v35, %s1929_s23  ;;  %v225_v45 = vstv %s2066_s4  ;;  %s1652_s17 = sld [smem:[#allocation5 + $0x86]] }
  0x3b   : > { %v170_v38 = vmul.f32 0.25, %v168_v37  ;;  %v218_v46 = vstv %s2069_s5  ;;  %s1656_s20 = sld [smem:[#allocation5 + $0x88]] }
  0x3c   : > { %v273_v53 = vstv %s2072_s6  ;;  %s1658_s28 = sld [smem:[#allocation5 + $0x89]] }
  0x3d   : > { %v301_v56 = vstv %s1646_s7  ;;  %s1660_s29 = sld [smem:[#allocation5 + $0x8a]] }
  0x3e   : > { %208 = vrot.lane.b32.xlu1 %v184_v36, %s1929_s23  ;;  %v329_v62 = vstv %s1648_s9  ;;  %s1662_s30 = sld [smem:[#allocation5 + $0x8b]] }
  0x3f   : > { %v357_v2 = vstv %s1650_s12  ;;  %s1666_s3 = sld [smem:[#allocation5 + $0x8d]] }
  0x40   : > { %v385_v5 = vstv %s1652_s17  ;;  %s2119_s4 = sld [smem:[#allocation5 + $0x2]] }
  0x41   : > { %v429_v8 = vstv %s1656_s20  ;;  %s1641_s5 = sld [smem:[#allocation5 + $0x1]] }
  0x42   : > { %197 = vrot.lane.b32.xlu0 %v170_v38, %s1929_s23  ;;  %v457_v13 = vstv %s1658_s28  ;;  %s1664_s23 = sld [smem:[#allocation5 + $0x8c]] }
  0x43   : > { %v485_v16 = vstv %s1660_s29  ;;  %s1645_s6 = sld [smem:[#allocation5 + $0x3]] }
  0x44   : > { %v513_v18 = vstv %s1662_s30  ;;  %s2134_s7 = sld [smem:[#allocation5 + $0x4]] }
  0x45   : > { %v569_v25 = vstv %s1666_s3  ;;  %s2136_s9 = sld [smem:[#allocation5 + $0x5]] }
  0x46   : > { %v260_v27 = vstv %s2119_s4  ;;  %s1651_s12 = sld [smem:[#allocation5 + $0x6]] }
  0x47   : > { %v232_v31 = vstv %s1641_s5  ;;  %s2152_s17 = sld [smem:[#allocation5 + $0x8]] }
  0x48   : > { %v541_v22 = vstv %s1664_s23  ;;  %s2154_s20 = sld [smem:[#allocation5 + $0x9]] }
  0x49   : > { %v288_v32 = vstv %s1645_s6  ;;  %s1659_s28 = sld [smem:[#allocation5 + $0xa]] }
  0x4a   : > { %v316_v36 = vstv %s2134_s7  ;;  %s2176_s29 = sld [smem:[#allocation5 + $0xb]] }
  0x4b   : > { %v344_v37 = vstv %s2136_s9  ;;  %s2178_s30 = sld [smem:[#allocation5 + $0xc]] }
  0x4c   : > { %s1665_s23 = sld [smem:[#allocation5 + $0xd]] }
  0x4d   : > { %s2200_s3 = sld [smem:[#allocation5 + $0xf]] }
  0x4e   : > { %s1670_s4 = sld [smem:[#allocation5 + $0x8f]] }
  0x4f   : > { %s2219_s5 = sld [smem:[#allocation5 + $0x10]] }
  0x50   : > { %s2235_s6 = sld [smem:[#allocation5 + $0x90]] }
  0x51   : > { %s1673_s7 = sld [smem:[#allocation5 + $0x11]] }
  0x52   : > { %s2255_s9 = sld [smem:[#allocation5 + $0x91]] }
  0xa8   : > { %v207_v39 = vpop.permute.xlu1 %206 }
  0xa9   : > { %212 = vst.msk [vmem:[#allocation3 + $0x3] sm:$0xff] %vm201_vm3, %v207_v39 }
  0xac   : > { %v196_v40 = vpop.permute.xlu0 %195 }
  0xad   : > { %202 = vst.msk [vmem:[#allocation2 + $0x3] sm:$0xff] %vm201_vm3, %v196_v40 }
  0xb0   : > { %v223_v42 = vld [vmem:[#allocation3] sm:$0xff]  ;;  %v209_v43 = vpop.permute.xlu1 %208 }
  0xb1   : > { %213 = vst.msk [vmem:[#allocation3 + $0xb] sm:$0xff] %vm201_vm3, %v209_v43  ;;  %v246_v44 = vmul.f32 %v245_v41, %v223_v42  ;;  %v226_v49 = vmul.f32 %v225_v45, %v223_v42  ;;  %v274_v63 = vmul.f32 %v273_v53, %v223_v42  ;;  %v302_v0 = vmul.f32 %v301_v56, %v223_v42  ;;  %v2099_v7 = vld [vmem:[#allocation3 + $0x1] sm:$0xff] }
  0xb2   : > { %v330_v1 = vmul.f32 %v329_v62, %v223_v42  ;;  %v386_v9 = vmul.f32 %v385_v5, %v223_v42  ;;  %v358_v10 = vmul.f32 %v357_v2, %v223_v42  ;;  %v430_v11 = vmul.f32 %v429_v8, %v2099_v7 }
  0xb3   : > { %250 = vrot.lane.b32.xlu0 %v246_v44, %s1930_s8  ;;  %v486_v19 = vmul.f32 %v485_v16, %v2099_v7  ;;  %v458_v20 = vmul.f32 %v457_v13, %v2099_v7  ;;  %v514_v21 = vmul.f32 %v513_v18, %v2099_v7  ;;  %v570_v28 = vmul.f32 %v569_v25, %v2099_v7 }
  0xb4   : > { %v2078_v47 = vld [vmem:[#allocation2] sm:$0xff]  ;;  %v198_v48 = vpop.permute.xlu0 %197  ;;  %v542_v29 = vmul.f32 %v541_v22, %v2099_v7 }
  0xb5   : > { %v219_v50 = vmul.f32 %v218_v46, %v2078_v47  ;;  %203 = vst.msk [vmem:[#allocation2 + $0xb] sm:$0xff] %vm201_vm3, %v198_v48  ;;  %v233_v33 = vmul.f32 %v232_v31, %v2078_v47  ;;  %v289_v35 = vmul.f32 %v288_v32, %v2078_v47  ;;  %v317_v38 = vmul.f32 %v316_v36, %v2078_v47 }
  0xb6   : > { %v261_v43 = vmul.f32 %v260_v27, %v2078_v47 }
  0xb7   : > { %v2082_v51 = vadd.f32 %v226_v49, %v219_v50  ;;  %v444_v49 = vstv %s2154_s20  ;;  %s2283_s20 = sld [smem:[#allocation5 + $0x13]] }
  0xb8   : > { %v224_v52 = vld [vmem:[#allocation3 + $0x8] sm:$0xff] }
  0xb9   : > { %v275_v54 = vmul.f32 %v273_v53, %v224_v52  ;;  %v247_v55 = vmul.f32 %v245_v41, %v224_v52  ;;  %v303_v57 = vmul.f32 %v301_v56, %v224_v52  ;;  %v227_v59 = vmul.f32 %v225_v45, %v224_v52  ;;  %v2105_v12 = vld [vmem:[#allocation3 + $0x9] sm:$0xff] }
  0xba   : > { %v359_v3 = vmul.f32 %v357_v2, %v224_v52  ;;  %v331_v4 = vmul.f32 %v329_v62, %v224_v52  ;;  %v387_v6 = vmul.f32 %v385_v5, %v224_v52  ;;  %v459_v14 = vmul.f32 %v457_v13, %v2105_v12  ;;  %v2162_v45 = vld [vmem:[#allocation2 + $0x1] sm:$0xff] }
  0xbb   : > { %280 = vrot.lane.b32.xlu2 %v275_v54, %s1931_s10  ;;  %252 = vrot.lane.b32.xlu1 %v247_v55, %s1930_s8  ;;  %v431_v15 = vmul.f32 %v429_v8, %v2105_v12  ;;  %v487_v17 = vmul.f32 %v485_v16, %v2105_v12  ;;  %v543_v23 = vmul.f32 %v541_v22, %v2105_v12  ;;  %v372_v41 = vstv %s1651_s12  ;;  %v2233_v22 = vld [vmem:[#allocation3 + $0xa] sm:$0xff]  ;;  %s2267_s12 = sld [smem:[#allocation5 + $0x12]] }
  0xbc   : > { %v2087_v58 = vld [vmem:[#allocation2 + $0x8] sm:$0xff]  ;;  %308 = vrot.lane.b32.xlu0 %v303_v57, %s1932_s11  ;;  %v515_v24 = vmul.f32 %v513_v18, %v2105_v12  ;;  %v571_v26 = vmul.f32 %v569_v25, %v2105_v12  ;;  %v373_v44 = vmul.f32 %v372_v41, %v2078_v47  ;;  %v472_v55 = vstv %s1659_s28  ;;  %s2296_s28 = sld [smem:[#allocation5 + $0x93]] }
  0xbd   : > { %v220_v60 = vmul.f32 %v218_v46, %v2087_v58  ;;  %v262_v30 = vmul.f32 %v260_v27, %v2087_v58  ;;  %v290_v34 = vmul.f32 %v288_v32, %v2087_v58  ;;  %v234_v39 = vmul.f32 %v232_v31, %v2087_v58  ;;  %v2165_v48 = vld [vmem:[#allocation2 + $0x9] sm:$0xff] }
  0xbe   : > { %v346_v40 = vmul.f32 %v344_v37, %v2087_v58  ;;  %v374_v42 = vmul.f32 %v372_v41, %v2087_v58  ;;  %v416_v46 = vstv %s2152_s17  ;;  %v318_v52 = vmul.f32 %v316_v36, %v2087_v58  ;;  %s1676_s17 = sld [smem:[#allocation5 + $0x92]] }
  0xbf   : > { %v2091_v61 = vadd.f32 %v227_v59, %v220_v60  ;;  %v417_v50 = vmul.f32 %v416_v46, %v2162_v45  ;;  %v446_v53 = vmul.f32 %v444_v49, %v2165_v48  ;;  %v474_v56 = vmul.f32 %v472_v55, %v2165_v48 }
  0xc0   : > { %v345_v57 = vmul.f32 %v344_v37, %v2078_v47  ;;  %v473_v58 = vmul.f32 %v472_v55, %v2162_v45  ;;  %v500_v60 = vstv %s2176_s29  ;;  %v528_v62 = vstv %s2178_s30  ;;  %s1679_s29 = sld [smem:[#allocation5 + $0x14]] }
  0xc1   : > { %v445_v5 = vmul.f32 %v444_v49, %v2162_v45  ;;  %v600_v13 = vstv %s2200_s3  ;;  %v641_v31 = vstv %s2235_s6  ;;  %v656_v32 = vstv %s1673_s7  ;;  %s2313_s30 = sld [smem:[#allocation5 + $0x94]] }
  0xc2   : > { %v684_v49 = vstv %s2267_s12  ;;  %s2325_s3 = sld [smem:[#allocation5 + $0x96]] }
  0xc3   : > { %306 = vrot.lane.b32.xlu2 %v302_v0, %s1932_s11  ;;  %278 = vrot.lane.b32.xlu1 %v274_v63, %s1931_s10  ;;  %v501_v63 = vmul.f32 %v500_v60, %v2162_v45  ;;  %v418_v0 = vmul.f32 %v416_v46, %v2165_v48  ;;  %s2357_s6 = sld [smem:[#allocation5 + $0x97]] }
  0xc4   : > { %334 = vrot.lane.b32.xlu0 %v330_v1, %s1933_s19  ;;  %v530_v1 = vmul.f32 %v528_v62, %v2165_v48  ;;  %s2361_s7 = sld [smem:[#allocation5 + $0x18]] }
  0xc5   : > { %s2385_s12 = sld [smem:[#allocation5 + $0x98]] }
  0xcb   : > { %364 = vrot.lane.b32.xlu2 %v359_v3, %s1934_s22  ;;  %336 = vrot.lane.b32.xlu1 %v331_v4, %s1933_s19  ;;  %v556_v3 = vstv %s1665_s23  ;;  %s2323_s23 = sld [smem:[#allocation5 + $0x16]] }
  0xcc   : > { %392 = vrot.lane.b32.xlu0 %v387_v6, %s1935_s26  ;;  %v558_v4 = vmul.f32 %v556_v3, %v2165_v48  ;;  %v557_v6 = vmul.f32 %v556_v3, %v2162_v45 }
  0xd3   : > { %390 = vrot.lane.b32.xlu2 %v386_v9, %s1935_s26  ;;  %362 = vrot.lane.b32.xlu1 %v358_v10, %s1934_s22 }
  0xd4   : > { %434 = vrot.lane.b32.xlu0 %v430_v11, %s1930_s8  ;;  %v2214_v11 = vld [vmem:[#allocation2 + $0x2] sm:$0xff] }
  0xd5   : > { %v601_v16 = vmul.f32 %v600_v13, %v2214_v11 }
  0xdb   : > { %464 = vrot.lane.b32.xlu2 %v459_v14, %s1931_s10  ;;  %436 = vrot.lane.b32.xlu1 %v431_v15, %s1930_s8  ;;  %v2217_v14 = vld [vmem:[#allocation3 + $0x2] sm:$0xff]  ;;  %v613_v15 = vstv %s1670_s4  ;;  %s2345_s4 = sld [smem:[#allocation5 + $0x17]] }
  0xdc   : > { %492 = vrot.lane.b32.xlu0 %v487_v17, %s1932_s11  ;;  %v502_v17 = vmul.f32 %v500_v60, %v2165_v48  ;;  %v614_v18 = vmul.f32 %v613_v15, %v2217_v14  ;;  %v615_v25 = vmul.f32 %v613_v15, %v2233_v22 }
  0xe3   : > { %490 = vrot.lane.b32.xlu2 %v486_v19, %s1932_s11  ;;  %462 = vrot.lane.b32.xlu1 %v458_v20, %s1931_s10 }
  0xe4   : > { %518 = vrot.lane.b32.xlu0 %v514_v21, %s1933_s19 }
  0xeb   : > { %548 = vrot.lane.b32.xlu2 %v543_v23, %s1934_s22  ;;  %520 = vrot.lane.b32.xlu1 %v515_v24, %s1933_s19  ;;  %v2237_v23 = vld [vmem:[#allocation2 + $0xa] sm:$0xff]  ;;  %v628_v24 = vstv %s2219_s5  ;;  %s2353_s5 = sld [smem:[#allocation5 + $0x7]] }
  0xec   : > { %576 = vrot.lane.b32.xlu0 %v571_v26, %s1935_s26  ;;  %v529_v26 = vmul.f32 %v528_v62, %v2162_v45  ;;  %v630_v27 = vmul.f32 %v628_v24, %v2237_v23  ;;  %v629_v41 = vmul.f32 %v628_v24, %v2214_v11  ;;  %v712_v62 = vstv %s2283_s20  ;;  %s2395_s20 = sld [smem:[#allocation5 + $0x99]] }
  0xf3   : > { %574 = vrot.lane.b32.xlu2 %v570_v28, %s1935_s26  ;;  %546 = vrot.lane.b32.xlu1 %v542_v29, %s1934_s22 }
  0xf4   : > { %267 = vrot.lane.b32.xlu0 %v262_v30, %s1931_s10 }
  0xfb   : > { %237 = vrot.lane.b32.xlu2 %v233_v33, %s1930_s8  ;;  %295 = vrot.lane.b32.xlu1 %v290_v34, %s1932_s11  ;;  %v642_v33 = vmul.f32 %v641_v31, %v2217_v14  ;;  %v602_v34 = vmul.f32 %v600_v13, %v2237_v23  ;;  %v740_v13 = vstv %s1679_s29  ;;  %s1667_s29 = sld [smem:[#allocation5 + $0xe]] }
  0xfc   : > { %293 = vrot.lane.b32.xlu0 %v289_v35, %s1932_s11  ;;  %v657_v35 = vmul.f32 %v656_v32, %v2214_v11 }
 0x103   : > { %321 = vrot.lane.b32.xlu1 %v317_v38, %s1933_s19  ;;  %239 = vrot.lane.b32.xlu2 %v234_v39, %s1930_s8  ;;  %v658_v39 = vmul.f32 %v656_v32, %v2237_v23  ;;  %v742_v32 = vmul.f32 %v740_v13, %v2237_v23 }
 0x104   : > { %351 = vrot.lane.b32.xlu0 %v346_v40, %s1934_s22  ;;  %v669_v40 = vstv %s2255_s9  ;;  %s2363_s9 = sld [smem:[#allocation5 + $0x87]] }
 0x10b   : > { %379 = vrot.lane.b32.xlu1 %v374_v42, %s1935_s26  ;;  %265 = vrot.lane.b32.xlu2 %v261_v43, %s1931_s10  ;;  %v671_v42 = vmul.f32 %v669_v40, %v2233_v22 }
 0x10c   : > { %377 = vrot.lane.b32.xlu0 %v373_v44, %s1935_s26 }
 0x113   : > { %421 = vrot.lane.b32.xlu1 %v417_v50, %s1930_s8  ;;  %323 = vrot.lane.b32.xlu2 %v318_v52, %s1933_s19  ;;  %v697_v50 = vstv %s1676_s17  ;;  %v685_v52 = vmul.f32 %v684_v49, %v2214_v11  ;;  %s2393_s17 = sld [smem:[#allocation5 + $0x19]] }
 0x114   : > { %451 = vrot.lane.b32.xlu0 %v446_v53, %s1931_s10  ;;  %v643_v53 = vmul.f32 %v641_v31, %v2233_v22  ;;  %v698_v55 = vmul.f32 %v697_v50, %v2217_v14 }
 0x115   : > { %v2174_v54 = vpop.permute.xlu2 %280 }
 0x11b   : > { %479 = vrot.lane.b32.xlu1 %v474_v56, %s1932_s11  ;;  %349 = vrot.lane.b32.xlu2 %v345_v57, %s1934_s22 }
 0x11c   : > { %477 = vrot.lane.b32.xlu0 %v473_v58, %s1932_s11 }
 0x11d   : > { %v2186_v59 = vpop.permute.xlu2 %306 }
 0x123   : > { %505 = vrot.lane.b32.xlu1 %v501_v63, %s1933_s19  ;;  %423 = vrot.lane.b32.xlu2 %v418_v0, %s1930_s8  ;;  %v699_v63 = vmul.f32 %v697_v50, %v2233_v22  ;;  %v670_v0 = vmul.f32 %v669_v40, %v2217_v14  ;;  %v784_v50 = vstv %s2323_s23  ;;  %s2423_s23 = sld [smem:[#allocation5 + $0x1b]] }
 0x124   : > { %535 = vrot.lane.b32.xlu0 %v530_v1, %s1934_s22  ;;  %v714_v1 = vmul.f32 %v712_v62, %v2237_v23 }
 0x125   : > { %v2196_v47 = vpop.permute.xlu2 %364  ;;  %v2198_v2 = vpop.permute.xlu0 %250 }
 0x12b   : > { %563 = vrot.lane.b32.xlu1 %v558_v4, %s1935_s26  ;;  %449 = vrot.lane.b32.xlu2 %v445_v5, %s1931_s10 }
 0x12c   : > { %561 = vrot.lane.b32.xlu0 %v557_v6, %s1935_s26  ;;  %v725_v6 = vstv %s2296_s28  ;;  %s2413_s28 = sld [smem:[#allocation5 + $0x1a]] }
 0x12d   : > { %v2208_v8 = vpop.permute.xlu2 %390  ;;  %v2210_v9 = vpop.permute.xlu1 %252  ;;  %v726_v15 = vmul.f32 %v725_v6, %v2217_v14 }
 0x12e   : > { %v2212_v10 = vpop.permute.xlu0 %308 }
 0x133   : > { %605 = vrot.lane.b32.xlu1 %v601_v16, %s1930_s8  ;;  %507 = vrot.lane.b32.xlu2 %v502_v17, %s1933_s19  ;;  %v686_v16 = vmul.f32 %v684_v49, %v2237_v23  ;;  %v741_v17 = vmul.f32 %v740_v13, %v2214_v11  ;;  %v2336_v49 = vld [vmem:[#allocation2 + $0x3] sm:$0xff] }
 0x134   : > { %618 = vrot.lane.b32.xlu0 %v614_v18, %s1930_s8 }
 0x135   : > { %v2227_v19 = vpop.permute.xlu2 %464  ;;  %v2229_v20 = vpop.permute.xlu1 %278 }
 0x136   : > { %v2231_v21 = vpop.permute.xlu0 %334 }
 0x13b   : > { %620 = vrot.lane.b32.xlu1 %v615_v25, %s1930_s8  ;;  %533 = vrot.lane.b32.xlu2 %v529_v26, %s1934_s22 }
 0x13c   : > { %635 = vrot.lane.b32.xlu0 %v630_v27, %s1931_s10 }
 0x13d   : > { %v2246_v28 = vpop.permute.xlu2 %490  ;;  %v2248_v29 = vpop.permute.xlu1 %336 }
 0x13e   : > { %v2250_v30 = vpop.permute.xlu0 %392 }
 0x143   : > { %646 = vrot.lane.b32.xlu1 %v642_v33, %s1931_s10  ;;  %607 = vrot.lane.b32.xlu2 %v602_v34, %s1930_s8  ;;  %v753_v33 = vstv %s2313_s30  ;;  %s2421_s30 = sld [smem:[#allocation5 + $0x9a]] }
 0x144   : > { %661 = vrot.lane.b32.xlu0 %v657_v35, %s1932_s11  ;;  %v755_v34 = vmul.f32 %v753_v33, %v2233_v22 }
 0x145   : > { %v2261_v36 = vpop.permute.xlu2 %548  ;;  %v2263_v37 = vpop.permute.xlu1 %362 }
 0x146   : > { %v2265_v38 = vpop.permute.xlu0 %434 }
 0x14b   : > { %663 = vrot.lane.b32.xlu1 %v658_v39, %s1932_s11  ;;  %633 = vrot.lane.b32.xlu2 %v629_v41, %s1931_s10 }
 0x14c   : > { %676 = vrot.lane.b32.xlu0 %v671_v42, %s1932_s11 }
 0x14d   : > { %v2276_v43 = vpop.permute.xlu2 %574  ;;  %v2278_v44 = vpop.permute.xlu1 %436 }
 0x14e   : > { %v2280_v46 = vpop.permute.xlu0 %492 }
 0x153   : > { %689 = vrot.lane.b32.xlu1 %v685_v52, %s1933_s19  ;;  %648 = vrot.lane.b32.xlu2 %v643_v53, %s1931_s10  ;;  %v2339_v53 = vld [vmem:[#allocation3 + $0x3] sm:$0xff] }
 0x154   : > { %702 = vrot.lane.b32.xlu0 %v698_v55, %s1933_s19  ;;  %v797_v55 = vstv %s2325_s3  ;;  %s1668_s3 = sld [smem:[#allocation5 + $0x8e]] }
 0x155   : > { %v2291_v56 = vpop.permute.xlu1 %462  ;;  %v238_v57 = vpop.permute.xlu2 %237 }
 0x156   : > { %v243_v58 = vadd.f32 %v238_v57, %v2082_v51  ;;  %v2294_v60 = vpop.permute.xlu0 %518 }
 0x158   : > { %v256_v18 = vadd.f32 %v2198_v2, %v243_v58  ;;  %v713_v2 = vmul.f32 %v712_v62, %v2214_v11  ;;  %v785_v58 = vmul.f32 %v784_v50, %v2336_v49  ;;  %v798_v62 = vmul.f32 %v797_v55, %v2339_v53 }
 0x15b   : > { %704 = vrot.lane.b32.xlu1 %v699_v63, %s1933_s19  ;;  %674 = vrot.lane.b32.xlu2 %v670_v0, %s1932_s11 }
 0x15c   : > { %719 = vrot.lane.b32.xlu0 %v714_v1, %s1934_s22 }
 0x15d   : > { %v2305_v51 = vpop.permute.xlu1 %520  ;;  %v240_v3 = vpop.permute.xlu2 %239 }
 0x15e   : > { %v244_v4 = vadd.f32 %v240_v3, %v2091_v61  ;;  %v2308_v5 = vpop.permute.xlu0 %576 }
 0x160   : > { %v257_v61 = vadd.f32 %v2210_v9, %v244_v4 }
 0x163   : > { %730 = vrot.lane.b32.xlu1 %v726_v15, %s1934_s22  ;;  %691 = vrot.lane.b32.xlu2 %v686_v16, %s1933_s19  ;;  %v2359_v15 = vld [vmem:[#allocation2 + $0xb] sm:$0xff]  ;;  %v812_v16 = vstv %s2345_s4  ;;  %s2443_s4 = sld [smem:[#allocation5 + $0x9b]] }
 0x164   : > { %745 = vrot.lane.b32.xlu0 %v741_v17, %s1935_s26  ;;  %v754_v17 = vmul.f32 %v753_v33, %v2217_v14  ;;  %v825_v33 = vstv %s2357_s6  ;;  %s2453_s6 = sld [smem:[#allocation5 + $0x9d]] }
 0x165   : > { %v2321_v24 = vpop.permute.xlu1 %546  ;;  %v266_v25 = vpop.permute.xlu2 %265 }
 0x166   : > { %v271_v26 = vadd.f32 %v266_v25, %v256_v18  ;;  %v268_v27 = vpop.permute.xlu0 %267 }
 0x167   : > { %v272_v31 = vadd.f32 %v268_v27, %v257_v61  ;;  %v814_v61 = vmul.f32 %v812_v16, %v2359_v15 }
 0x168   : > { %v284_v35 = vadd.f32 %v2229_v20, %v271_v26 }
 0x169   : > { %v285_v9 = vadd.f32 %v2174_v54, %v272_v31  ;;  %v727_v54 = vmul.f32 %v725_v6, %v2233_v22  ;;  %v2355_v6 = vld [vmem:[#allocation3 + $0xb] sm:$0xff] }
 0x16b   : > { %747 = vrot.lane.b32.xlu1 %v742_v32, %s1935_s26  ;;  %717 = vrot.lane.b32.xlu2 %v713_v2, %s1934_s22 }
 0x16c   : > { %760 = vrot.lane.b32.xlu0 %v755_v34, %s1935_s26 }
 0x16d   : > { %v296_v39 = vpop.permute.xlu1 %295  ;;  %v324_v40 = vpop.permute.xlu2 %323 }
 0x16e   : > { %v300_v41 = vadd.f32 %v296_v39, %v285_v9  ;;  %v294_v42 = vpop.permute.xlu0 %293  ;;  %v840_v9 = vstv %s2361_s7  ;;  %s2470_s7 = sld [smem:[#allocation5 + $0x1e]] }
 0x16f   : > { %v299_v52 = vadd.f32 %v294_v42, %v284_v35  ;;  %v409_v35 = vstv %s2363_s9  ;;  %v786_v42 = vmul.f32 %v784_v50, %v2359_v15  ;;  %s2478_s9 = sld [smem:[#allocation5 + $0x9e]] }
 0x170   : > { %v313_v57 = vadd.f32 %v2212_v10, %v300_v41 }
 0x171   : > { %v312_v0 = vadd.f32 %v2186_v59, %v299_v52  ;;  %v411_v52 = vmul.f32 %v409_v35, %v2105_v12 }
 0x172   : > { %v328_v20 = vadd.f32 %v324_v40, %v313_v57  ;;  %v841_v57 = vmul.f32 %v840_v9, %v2336_v49 }
 0x173   : > { %789 = vrot.lane.b32.xlu1 %v785_v58, %s1930_s8  ;;  %732 = vrot.lane.b32.xlu2 %v727_v54, %s1934_s22  ;;  %v410_v58 = vmul.f32 %v409_v35, %v2099_v7  ;;  %v896_v35 = vstv %s2413_s28  ;;  %s2504_s28 = sld [smem:[#allocation5 + $0xa0]] }
 0x174   : > { %v341_v63 = vadd.f32 %v2248_v29, %v328_v20  ;;  %802 = vrot.lane.b32.xlu0 %v798_v62, %s1930_s8  ;;  %v799_v29 = vmul.f32 %v797_v55, %v2355_v6 }
 0x175   : > { %v322_v10 = vpop.permute.xlu1 %321  ;;  %v350_v1 = vpop.permute.xlu2 %349 }
 0x176   : > { %v327_v3 = vadd.f32 %v322_v10, %v312_v0  ;;  %v352_v4 = vpop.permute.xlu0 %351  ;;  %v853_v0 = vstv %s2385_s12  ;;  %v813_v10 = vmul.f32 %v812_v16, %v2336_v49  ;;  %s2482_s12 = sld [smem:[#allocation5 + $0x1f]] }
 0x177   : > { %v356_v13 = vadd.f32 %v352_v4, %v341_v63  ;;  %v842_v63 = vmul.f32 %v840_v9, %v2359_v15 }
 0x178   : > { %v340_v59 = vadd.f32 %v2231_v21, %v327_v3  ;;  %v402_v21 = vstv %s2353_s5  ;;  %v855_v3 = vmul.f32 %v853_v0, %v2355_v6  ;;  %s2451_s5 = sld [smem:[#allocation5 + $0x1d]] }
 0x179   : > { %v369_v26 = vadd.f32 %v2196_v47, %v356_v13  ;;  %v404_v39 = vmul.f32 %v402_v21, %v2165_v48  ;;  %v403_v41 = vmul.f32 %v402_v21, %v2162_v45  ;;  %v826_v47 = vmul.f32 %v825_v33, %v2339_v53 }
 0x17a   : > { %v355_v18 = vadd.f32 %v350_v1, %v340_v59  ;;  %v827_v21 = vmul.f32 %v825_v33, %v2355_v6 }
 0x17b   : > { %804 = vrot.lane.b32.xlu1 %v799_v29, %s1930_s8  ;;  %758 = vrot.lane.b32.xlu2 %v754_v17, %s1935_s26 }
 0x17c   : > { %v368_v25 = vadd.f32 %v2263_v37, %v355_v18  ;;  %819 = vrot.lane.b32.xlu0 %v814_v61, %s1931_s10  ;;  %v868_v18 = vstv %s2393_s17  ;;  %v881_v61 = vstv %s2395_s20  ;;  %s2493_s17 = sld [smem:[#allocation5 + $0x9f]] }
 0x17d   : > { %v380_v27 = vpop.permute.xlu1 %379  ;;  %v424_v31 = vpop.permute.xlu2 %423  ;;  %s2501_s20 = sld [smem:[#allocation5 + $0x20]] }
 0x17e   : > { %v384_v32 = vadd.f32 %v380_v27, %v369_v26  ;;  %v378_v2 = vpop.permute.xlu0 %377  ;;  %v869_v26 = vmul.f32 %v868_v18, %v2336_v49  ;;  %v882_v27 = vmul.f32 %v881_v61, %v2339_v53 }
 0x17f   : > { %v383_v34 = vadd.f32 %v378_v2, %v368_v25 }
 0x180   : > { %v397_v40 = vadd.f32 %v2250_v30, %v384_v32 }
 0x181   : > { %v396_v37 = vadd.f32 %v2208_v8, %v383_v34 }
 0x182   : > { %v406_v55 = vadd.f32 %v404_v39, %v397_v40  ;;  %v898_v40 = vmul.f32 %v896_v35, %v2359_v15 }
 0x183   : > { %v405_v48 = vadd.f32 %v403_v41, %v396_v37  ;;  %830 = vrot.lane.b32.xlu1 %v826_v47, %s1931_s10  ;;  %791 = vrot.lane.b32.xlu2 %v786_v42, %s1930_s8 }
 0x184   : > { %v413_v45 = vadd.f32 %v411_v52, %v406_v55  ;;  %845 = vrot.lane.b32.xlu0 %v841_v57, %s1932_s11  ;;  %v909_v57 = vstv %s2421_s30  ;;  %s2516_s30 = sld [smem:[#allocation5 + $0x95]] }
 0x185   : > { %v412_v8 = vadd.f32 %v410_v58, %v405_v48  ;;  %v422_v30 = vpop.permute.xlu1 %421  ;;  %v450_v50 = vpop.permute.xlu2 %449  ;;  %v924_v48 = vstv %s2423_s23  ;;  %s2520_s23 = sld [smem:[#allocation5 + $0x21]] }
 0x186   : > { %v428_v54 = vadd.f32 %v424_v31, %v413_v45  ;;  %v452_v20 = vpop.permute.xlu0 %451 }
 0x187   : > { %v427_v12 = vadd.f32 %v422_v30, %v412_v8  ;;  %v593_v8 = vstv %s1668_s3  ;;  %s2526_s3 = sld [smem:[#allocation5 + $0xa1]] }
 0x188   : > { %v441_v7 = vadd.f32 %v2278_v44, %v428_v54  ;;  %v870_v54 = vmul.f32 %v868_v18, %v2359_v15  ;;  %v2462_v18 = vld [vmem:[#allocation2 + $0x4] sm:$0xff] }
 0x189   : > { %v440_v62 = vadd.f32 %v2265_v38, %v427_v12 }
 0x18a   : > { %v456_v1 = vadd.f32 %v452_v20, %v441_v7  ;;  %v595_v20 = vmul.f32 %v593_v8, %v2233_v22  ;;  %v925_v7 = vmul.f32 %v924_v48, %v2336_v49 }
 0x18b   : > { %v455_v4 = vadd.f32 %v450_v50, %v440_v62  ;;  %847 = vrot.lane.b32.xlu1 %v842_v63, %s1932_s11  ;;  %817 = vrot.lane.b32.xlu2 %v813_v10, %s1931_s10 }
 0x18c   : > { %v469_v13 = vadd.f32 %v2227_v19, %v456_v1  ;;  %860 = vrot.lane.b32.xlu0 %v855_v3, %s1932_s11  ;;  %v926_v1 = vmul.f32 %v924_v48, %v2359_v15  ;;  %v937_v3 = vstv %s2443_s4  ;;  %s2529_s4 = sld [smem:[#allocation5 + $0x22]] }
 0x18d   : > { %v468_v38 = vadd.f32 %v2291_v56, %v455_v4  ;;  %v480_v44 = vpop.permute.xlu1 %479  ;;  %v508_v59 = vpop.permute.xlu2 %507  ;;  %v897_v4 = vmul.f32 %v896_v35, %v2336_v49  ;;  %v996_v35 = vstv %s2470_s7  ;;  %s2556_s7 = sld [smem:[#allocation5 + $0xa4]] }
 0x18e   : > { %v484_v29 = vadd.f32 %v480_v44, %v469_v13  ;;  %v478_v17 = vpop.permute.xlu0 %477  ;;  %v939_v13 = vmul.f32 %v937_v3, %v2355_v6 }
 0x18f   : > { %v483_v16 = vadd.f32 %v478_v17, %v468_v38 }
 0x190   : > { %v497_v25 = vadd.f32 %v2280_v46, %v484_v29 }
 0x191   : > { %v496_v31 = vadd.f32 %v2246_v28, %v483_v16  ;;  %v854_v28 = vmul.f32 %v853_v0, %v2339_v53  ;;  %v968_v16 = vstv %s2451_s5  ;;  %s2543_s5 = sld [smem:[#allocation5 + $0xa2]] }
 0x192   : > { %v512_v19 = vadd.f32 %v508_v59, %v497_v25  ;;  %v981_v25 = vstv %s2453_s6  ;;  %s2553_s6 = sld [smem:[#allocation5 + $0x24]] }
 0x193   : > { %873 = vrot.lane.b32.xlu1 %v869_v26, %s1933_s19  ;;  %832 = vrot.lane.b32.xlu2 %v827_v21, %s1931_s10  ;;  %v969_v21 = vmul.f32 %v968_v16, %v2462_v18 }
 0x194   : > { %v525_v56 = vadd.f32 %v2305_v51, %v512_v19  ;;  %886 = vrot.lane.b32.xlu0 %v882_v27, %s1933_s19  ;;  %v883_v51 = vmul.f32 %v881_v61, %v2355_v6  ;;  %v2465_v61 = vld [vmem:[#allocation3 + $0x4] sm:$0xff]  ;;  %v911_v19 = vmul.f32 %v909_v57, %v2355_v6 }
 0x195   : > { %v506_v46 = vpop.permute.xlu1 %505  ;;  %v534_v32 = vpop.permute.xlu2 %533 }
 0x196   : > { %v511_v2 = vadd.f32 %v506_v46, %v496_v31  ;;  %v536_v33 = vpop.permute.xlu0 %535 }
 0x197   : > { %v540_v34 = vadd.f32 %v536_v33, %v525_v56  ;;  %v982_v56 = vmul.f32 %v981_v25, %v2465_v61  ;;  %v2476_v33 = vld [vmem:[#allocation3 + $0xc] sm:$0xff] }
 0x198   : > { %v524_v9 = vadd.f32 %v2294_v60, %v511_v2  ;;  %v586_v60 = vstv %s1667_s29  ;;  %s2514_s29 = sld [smem:[#allocation5 + $0x15]] }
 0x199   : > { %v553_v37 = vadd.f32 %v2261_v36, %v540_v34  ;;  %v588_v45 = vmul.f32 %v586_v60, %v2237_v23  ;;  %v587_v50 = vmul.f32 %v586_v60, %v2214_v11  ;;  %v910_v36 = vmul.f32 %v909_v57, %v2339_v53  ;;  %v2480_v34 = vld [vmem:[#allocation2 + $0xc] sm:$0xff] }
 0x19a   : > { %v539_v39 = vadd.f32 %v534_v32, %v524_v9  ;;  %v594_v23 = vmul.f32 %v593_v8, %v2217_v14 }
 0x19b   : > { %888 = vrot.lane.b32.xlu1 %v883_v51, %s1933_s19  ;;  %858 = vrot.lane.b32.xlu2 %v854_v28, %s1932_s11  ;;  %v983_v51 = vmul.f32 %v981_v25, %v2476_v33  ;;  %v938_v28 = vmul.f32 %v937_v3, %v2339_v53  ;;  %v1080_v25 = vstv %s2520_s23  ;;  %s2618_s23 = sld [smem:[#allocation5 + $0x9c]] }
 0x19c   : > { %v552_v41 = vadd.f32 %v2321_v24, %v539_v39  ;;  %903 = vrot.lane.b32.xlu0 %v898_v40, %s1934_s22  ;;  %v998_v40 = vmul.f32 %v996_v35, %v2480_v34 }
 0x19d   : > { %v564_v47 = vpop.permute.xlu1 %563  ;;  %v608_v42 = vpop.permute.xlu2 %607 }
 0x19e   : > { %v568_v52 = vadd.f32 %v564_v47, %v553_v37  ;;  %v562_v55 = vpop.permute.xlu0 %561 }
 0x19f   : > { %v567_v58 = vadd.f32 %v562_v55, %v552_v41 }
 0x1a0   : > { %v581_v30 = vadd.f32 %v2308_v5, %v568_v52  ;;  %v1024_v52 = vstv %s2482_s12  ;;  %s2580_s12 = sld [smem:[#allocation5 + $0xa5]] }
 0x1a1   : > { %v580_v24 = vadd.f32 %v2276_v43, %v567_v58  ;;  %v970_v58 = vmul.f32 %v968_v16, %v2480_v34 }
 0x1a2   : > { %v590_v12 = vadd.f32 %v588_v45, %v581_v30  ;;  %v1025_v45 = vmul.f32 %v1024_v52, %v2462_v18 }
 0x1a3   : > { %v589_v62 = vadd.f32 %v587_v50, %v580_v24  ;;  %914 = vrot.lane.b32.xlu1 %v910_v36, %s1934_s22  ;;  %875 = vrot.lane.b32.xlu2 %v870_v54, %s1933_s19  ;;  %v1037_v36 = vstv %s2493_s17  ;;  %s2584_s17 = sld [smem:[#allocation5 + $0x26]] }
 0x1a4   : > { %v597_v11 = vadd.f32 %v595_v20, %v590_v12  ;;  %929 = vrot.lane.b32.xlu0 %v925_v7, %s1935_s26  ;;  %v1026_v20 = vmul.f32 %v1024_v52, %v2480_v34  ;;  %v997_v12 = vmul.f32 %v996_v35, %v2462_v18  ;;  %v1093_v35 = vstv %s2526_s3  ;;  %s2622_s3 = sld [smem:[#allocation5 + $0x28]] }
 0x1a5   : > { %v596_v43 = vadd.f32 %v594_v23, %v589_v62  ;;  %v606_v5 = vpop.permute.xlu1 %605  ;;  %v634_v63 = vpop.permute.xlu2 %633  ;;  %v1039_v23 = vmul.f32 %v1037_v36, %v2476_v33 }
 0x1a6   : > { %v612_v0 = vadd.f32 %v608_v42, %v597_v11  ;;  %v619_v10 = vpop.permute.xlu0 %618  ;;  %v1009_v42 = vstv %s2478_s9  ;;  %s2572_s9 = sld [smem:[#allocation5 + $0x25]] }
 0x1a7   : > { %v611_v22 = vadd.f32 %v606_v5, %v596_v43  ;;  %v1010_v57 = vmul.f32 %v1009_v42, %v2465_v61 }
 0x1a9   : > { %v624_v14 = vadd.f32 %v619_v10, %v611_v22 }
 0x1ab   : > { %v639_v38 = vadd.f32 %v634_v63, %v624_v14  ;;  %931 = vrot.lane.b32.xlu1 %v926_v1, %s1935_s26  ;;  %901 = vrot.lane.b32.xlu2 %v897_v4, %s1934_s22  ;;  %v1052_v63 = vstv %s2501_s20  ;;  %v1011_v14 = vmul.f32 %v1009_v42, %v2476_v33  ;;  %s2595_s20 = sld [smem:[#allocation5 + $0xa6]] }
 0x1ac   : > { %944 = vrot.lane.b32.xlu0 %v939_v13, %s1935_s26  ;;  %v1053_v22 = vmul.f32 %v1052_v63, %v2462_v18 }
 0x1ad   : > { %v621_v44 = vpop.permute.xlu1 %620  ;;  %v649_v59 = vpop.permute.xlu2 %648 }
 0x1ae   : > { %v625_v29 = vadd.f32 %v621_v44, %v612_v0  ;;  %v636_v17 = vpop.permute.xlu0 %635  ;;  %v1065_v0 = vstv %s2504_s28  ;;  %s2603_s28 = sld [smem:[#allocation5 + $0x27]] }
 0x1af   : > { %v1066_v3 = vmul.f32 %v1065_v0, %v2465_v61  ;;  %v1067_v16 = vmul.f32 %v1065_v0, %v2476_v33 }
 0x1b0   : > { %v640_v26 = vadd.f32 %v636_v17, %v625_v29  ;;  %v777_v17 = vstv %s2516_s30  ;;  %s2616_s30 = sld [smem:[#allocation5 + $0x1c]] }
 0x1b2   : > { %v653_v27 = vadd.f32 %v649_v59, %v640_v26  ;;  %v770_v59 = vstv %s2514_s29  ;;  %v1038_v26 = vmul.f32 %v1037_v36, %v2465_v61  ;;  %s2606_s29 = sld [smem:[#allocation5 + $0xa7]] }
 0x1b3   : > { %973 = vrot.lane.b32.xlu1 %v969_v21, %s1930_s8  ;;  %916 = vrot.lane.b32.xlu2 %v911_v19, %s1934_s22  ;;  %v771_v21 = vmul.f32 %v770_v59, %v2336_v49  ;;  %v772_v49 = vmul.f32 %v770_v59, %v2359_v15 }
 0x1b4   : > { %986 = vrot.lane.b32.xlu0 %v982_v56, %s1930_s8  ;;  %v778_v56 = vmul.f32 %v777_v17, %v2339_v53  ;;  %v1054_v53 = vmul.f32 %v1052_v63, %v2480_v34 }
 0x1b5   : > { %v647_v31 = vpop.permute.xlu1 %646  ;;  %v675_v46 = vpop.permute.xlu2 %674 }
 0x1b6   : > { %v652_v32 = vadd.f32 %v647_v31, %v639_v38  ;;  %v662_v2 = vpop.permute.xlu0 %661 }
 0x1b8   : > { %v667_v9 = vadd.f32 %v662_v2, %v652_v32 }
 0x1ba   : > { %v680_v39 = vadd.f32 %v675_v46, %v667_v9 }
 0x1bb   : > { %988 = vrot.lane.b32.xlu1 %v983_v51, %s1930_s8  ;;  %942 = vrot.lane.b32.xlu2 %v938_v28, %s1935_s26  ;;  %v1108_v28 = vstv %s2529_s4  ;;  %s2628_s4 = sld [smem:[#allocation5 + $0xa8]] }
 0x1bc   : > { %1003 = vrot.lane.b32.xlu0 %v998_v40, %s1931_s10  ;;  %v1094_v40 = vmul.f32 %v1093_v35, %v2465_v61 }
 0x1bd   : > { %v664_v41 = vpop.permute.xlu1 %663  ;;  %v692_v37 = vpop.permute.xlu2 %691 }
 0x1be   : > { %v668_v60 = vadd.f32 %v664_v41, %v653_v27  ;;  %v677_v47 = vpop.permute.xlu0 %676  ;;  %v1082_v27 = vmul.f32 %v1080_v25, %v2480_v34  ;;  %v779_v41 = vmul.f32 %v777_v17, %v2355_v6 }
 0x1c0   : > { %v681_v55 = vadd.f32 %v677_v47, %v668_v60  ;;  %v1109_v60 = vmul.f32 %v1108_v28, %v2462_v18 }
 0x1c2   : > { %v696_v48 = vadd.f32 %v692_v37, %v681_v55 }
 0x1c3   : > { %1014 = vrot.lane.b32.xlu1 %v1010_v57, %s1931_s10  ;;  %975 = vrot.lane.b32.xlu2 %v970_v58, %s1930_s8  ;;  %v1121_v58 = vstv %s2543_s5  ;;  %s2631_s5 = sld [smem:[#allocation5 + $0x29]] }
 0x1c4   : > { %1029 = vrot.lane.b32.xlu0 %v1025_v45, %s1932_s11  ;;  %v1081_v45 = vmul.f32 %v1080_v25, %v2462_v18 }
 0x1c5   : > { %v690_v8 = vpop.permute.xlu1 %689  ;;  %v718_v30 = vpop.permute.xlu2 %717 }
 0x1c6   : > { %v695_v50 = vadd.f32 %v690_v8, %v680_v39  ;;  %v703_v24 = vpop.permute.xlu0 %702 }
 0x1c8   : > { %v708_v54 = vadd.f32 %v703_v24, %v695_v50 }
 0x1ca   : > { %v723_v7 = vadd.f32 %v718_v30, %v708_v54  ;;  %v1123_v30 = vmul.f32 %v1121_v58, %v2476_v33 }
 0x1cb   : > { %1031 = vrot.lane.b32.xlu1 %v1026_v20, %s1932_s11  ;;  %1001 = vrot.lane.b32.xlu2 %v997_v12, %s1931_s10  ;;  %v2564_v20 = vld [vmem:[#allocation2 + $0x5] sm:$0xff]  ;;  %v1152_v12 = vstv %s2553_s6  ;;  %s2645_s6 = sld [smem:[#allocation5 + $0xa9]] }
 0x1cc   : > { %1044 = vrot.lane.b32.xlu0 %v1039_v23, %s1932_s11  ;;  %v1165_v23 = vstv %s2556_s7  ;;  %s2655_s7 = sld [smem:[#allocation5 + $0x2b]] }
 0x1cd   : > { %v705_v62 = vpop.permute.xlu1 %704  ;;  %v733_v11 = vpop.permute.xlu2 %732 }
 0x1ce   : > { %v709_v43 = vadd.f32 %v705_v62, %v696_v48  ;;  %v720_v5 = vpop.permute.xlu0 %719  ;;  %v1110_v48 = vmul.f32 %v1108_v28, %v2480_v34  ;;  %v1221_v28 = vstv %s2595_s20  ;;  %s2686_s20 = sld [smem:[#allocation5 + $0x2d]] }
 0x1d0   : > { %v724_v10 = vadd.f32 %v720_v5, %v709_v43  ;;  %v1095_v43 = vmul.f32 %v1093_v35, %v2476_v33 }
 0x1d2   : > { %v737_v1 = vadd.f32 %v733_v11, %v724_v10  ;;  %v1153_v11 = vmul.f32 %v1152_v12, %v2564_v20 }
 0x1d3   : > { %1057 = vrot.lane.b32.xlu1 %v1053_v22, %s1933_s19  ;;  %1016 = vrot.lane.b32.xlu2 %v1011_v14, %s1931_s10 }
 0x1d4   : > { %1070 = vrot.lane.b32.xlu0 %v1066_v3, %s1933_s19  ;;  %v2582_v3 = vld [vmem:[#allocation2 + $0xd] sm:$0xff] }
 0x1d5   : > { %v731_v4 = vpop.permute.xlu1 %730  ;;  %v759_v13 = vpop.permute.xlu2 %758 }
 0x1d6   : > { %v736_v38 = vadd.f32 %v731_v4, %v723_v7  ;;  %v746_v44 = vpop.permute.xlu0 %745  ;;  %v2567_v7 = vld [vmem:[#allocation3 + $0x5] sm:$0xff] }
 0x1d7   : > { %v1166_v63 = vmul.f32 %v1165_v23, %v2567_v7 }
 0x1d8   : > { %v751_v29 = vadd.f32 %v746_v44, %v736_v38  ;;  %v1180_v38 = vstv %s2572_s9  ;;  %v1122_v44 = vmul.f32 %v1121_v58, %v2465_v61  ;;  %s2658_s9 = sld [smem:[#allocation5 + $0xab]] }
 0x1d9   : > { %v1182_v59 = vmul.f32 %v1180_v38, %v2582_v3 }
 0x1da   : > { %v764_v19 = vadd.f32 %v759_v13, %v751_v29 }
 0x1db   : > { %1072 = vrot.lane.b32.xlu1 %v1067_v16, %s1933_s19  ;;  %1042 = vrot.lane.b32.xlu2 %v1038_v26, %s1932_s11 }
 0x1dc   : > { %v773_v31 = vadd.f32 %v771_v21, %v764_v19  ;;  %1087 = vrot.lane.b32.xlu0 %v1082_v27, %s1934_s22  ;;  %v1193_v21 = vstv %s2580_s12  ;;  %v1208_v19 = vstv %s2584_s17  ;;  %s2674_s12 = sld [smem:[#allocation5 + $0x2c]] }
 0x1dd   : > { %v748_v46 = vpop.permute.xlu1 %747  ;;  %v792_v32 = vpop.permute.xlu2 %791  ;;  %s2682_s17 = sld [smem:[#allocation5 + $0xac]] }
 0x1de   : > { %v780_v2 = vadd.f32 %v778_v56, %v773_v31  ;;  %v752_v9 = vadd.f32 %v748_v46, %v737_v1  ;;  %v761_v51 = vpop.permute.xlu0 %760  ;;  %v2578_v1 = vld [vmem:[#allocation3 + $0xd] sm:$0xff]  ;;  %v1194_v56 = vmul.f32 %v1193_v21, %v2567_v7  ;;  %v1154_v31 = vmul.f32 %v1152_v12, %v2582_v3 }
 0x1df   : > { %v1167_v13 = vmul.f32 %v1165_v23, %v2578_v1  ;;  %v1209_v46 = vmul.f32 %v1208_v19, %v2564_v20  ;;  %v1195_v58 = vmul.f32 %v1193_v21, %v2578_v1  ;;  %v1264_v12 = vstv %s2622_s3  ;;  %s2724_s3 = sld [smem:[#allocation5 + $0x2f]] }
 0x1e0   : > { %v765_v39 = vadd.f32 %v761_v51, %v752_v9  ;;  %v1222_v23 = vmul.f32 %v1221_v28, %v2567_v7 }
 0x1e2   : > { %v774_v37 = vadd.f32 %v772_v49, %v765_v39  ;;  %v1210_v39 = vmul.f32 %v1208_v19, %v2582_v3 }
 0x1e3   : > { %1098 = vrot.lane.b32.xlu1 %v1094_v40, %s1934_s22  ;;  %1059 = vrot.lane.b32.xlu2 %v1054_v53, %s1933_s19  ;;  %v1181_v40 = vmul.f32 %v1180_v38, %v2564_v20  ;;  %v1223_v53 = vmul.f32 %v1221_v28, %v2578_v1 }
 0x1e4   : > { %v781_v47 = vadd.f32 %v779_v41, %v774_v37  ;;  %1113 = vrot.lane.b32.xlu0 %v1109_v60, %s1935_s26 }
 0x1e5   : > { %v790_v42 = vpop.permute.xlu1 %789  ;;  %v818_v15 = vpop.permute.xlu2 %817 }
 0x1e6   : > { %v796_v52 = vadd.f32 %v792_v32, %v781_v47  ;;  %v795_v55 = vadd.f32 %v790_v42, %v780_v2  ;;  %v803_v57 = vpop.permute.xlu0 %802 }
 0x1e8   : > { %v808_v6 = vadd.f32 %v803_v57, %v795_v55 }
 0x1ea   : > { %v823_v8 = vadd.f32 %v818_v15, %v808_v6  ;;  %v1236_v15 = vstv %s2603_s28  ;;  %s2697_s28 = sld [smem:[#allocation5 + $0xad]] }
 0x1eb   : > { %1115 = vrot.lane.b32.xlu1 %v1110_v48, %s1935_s26  ;;  %1085 = vrot.lane.b32.xlu2 %v1081_v45, %s1934_s22  ;;  %v1237_v57 = vmul.f32 %v1236_v15, %v2564_v20 }
 0x1ec   : > { %1128 = vrot.lane.b32.xlu0 %v1123_v30, %s1935_s26 }
 0x1ed   : > { %v805_v50 = vpop.permute.xlu1 %804  ;;  %v833_v24 = vpop.permute.xlu2 %832 }
 0x1ee   : > { %v809_v36 = vadd.f32 %v805_v50, %v796_v52  ;;  %v820_v54 = vpop.permute.xlu0 %819  ;;  %v1249_v52 = vstv %s2606_s29  ;;  %s2705_s29 = sld [smem:[#allocation5 + $0x2e]] }
 0x1ef   : > { %v1250_v6 = vmul.f32 %v1249_v52, %v2567_v7 }
 0x1f0   : > { %v824_v62 = vadd.f32 %v820_v54, %v809_v36  ;;  %v1251_v54 = vmul.f32 %v1249_v52, %v2578_v1 }
 0x1f2   : > { %v837_v5 = vadd.f32 %v833_v24, %v824_v62  ;;  %v954_v24 = vstv %s2616_s30  ;;  %v961_v62 = vstv %s2618_s23  ;;  %s2708_s30 = sld [smem:[#allocation5 + $0xae]] }
 0x1f3   : > { %1157 = vrot.lane.b32.xlu1 %v1153_v11, %s1930_s8  ;;  %1100 = vrot.lane.b32.xlu2 %v1095_v43, %s1934_s22  ;;  %v1266_v43 = vmul.f32 %v1264_v12, %v2582_v3  ;;  %s2720_s23 = sld [smem:[#allocation5 + $0xa3]] }
 0x1f4   : > { %1170 = vrot.lane.b32.xlu0 %v1166_v63, %s1930_s8  ;;  %v962_v63 = vmul.f32 %v961_v62, %v2465_v61 }
 0x1f5   : > { %v831_v0 = vpop.permute.xlu1 %830  ;;  %v859_v10 = vpop.permute.xlu2 %858 }
 0x1f6   : > { %v836_v22 = vadd.f32 %v831_v0, %v823_v8  ;;  %v846_v14 = vpop.permute.xlu0 %845 }
 0x1f8   : > { %v851_v4 = vadd.f32 %v846_v14, %v836_v22 }
 0x1fa   : > { %v864_v29 = vadd.f32 %v859_v10, %v851_v4 }
 0x1fb   : > { %1172 = vrot.lane.b32.xlu1 %v1167_v13, %s1930_s8  ;;  %1126 = vrot.lane.b32.xlu2 %v1122_v44, %s1935_s26  ;;  %v1277_v13 = vstv %s2628_s4  ;;  %v1292_v44 = vstv %s2631_s5  ;;  %s2730_s4 = sld [smem:[#allocation5 + $0xaf]] }
 0x1fc   : > { %1187 = vrot.lane.b32.xlu0 %v1182_v59, %s1931_s10  ;;  %v1293_v61 = vmul.f32 %v1292_v44, %v2564_v20  ;;  %s2733_s5 = sld [smem:[#allocation5 + $0x30]] }
 0x1fd   : > { %v848_v17 = vpop.permute.xlu1 %847  ;;  %v876_v16 = vpop.permute.xlu2 %875 }
 0x1fe   : > { %v852_v25 = vadd.f32 %v848_v17, %v837_v5  ;;  %v861_v26 = vpop.permute.xlu0 %860  ;;  %v955_v5 = vmul.f32 %v954_v24, %v2462_v18  ;;  %v956_v18 = vmul.f32 %v954_v24, %v2480_v34  ;;  %v1238_v17 = vmul.f32 %v1236_v15, %v2582_v3 }
 0x200   : > { %v865_v27 = vadd.f32 %v861_v26, %v852_v25  ;;  %v963_v25 = vmul.f32 %v961_v62, %v2476_v33 }
 0x202   : > { %v880_v32 = vadd.f32 %v876_v16, %v865_v27 }
 0x203   : > { %1198 = vrot.lane.b32.xlu1 %v1194_v56, %s1931_s10  ;;  %1159 = vrot.lane.b32.xlu2 %v1154_v31, %s1930_s8  ;;  %v1305_v31 = vstv %s2645_s6 }
 0x204   : > { %1213 = vrot.lane.b32.xlu0 %v1209_v46, %s1932_s11  ;;  %v1294_v46 = vmul.f32 %v1292_v44, %v2582_v3  ;;  %v1405_v44 = vstv %s2697_s28 }
 0x205   : > { %v874_v2 = vpop.permute.xlu1 %873  ;;  %v902_v9 = vpop.permute.xlu2 %901 }
 0x206   : > { %v879_v51 = vadd.f32 %v874_v2, %v864_v29  ;;  %v887_v35 = vpop.permute.xlu0 %886  ;;  %v1278_v29 = vmul.f32 %v1277_v13, %v2567_v7  ;;  %v1307_v2 = vmul.f32 %v1305_v31, %v2578_v1 }
 0x208   : > { %v892_v49 = vadd.f32 %v887_v35, %v879_v51 }
 0x20a   : > { %v907_v41 = vadd.f32 %v902_v9, %v892_v49 }
 0x20b   : > { %1215 = vrot.lane.b32.xlu1 %v1210_v39, %s1932_s11  ;;  %1185 = vrot.lane.b32.xlu2 %v1181_v40, %s1931_s10  ;;  %v2666_v39 = vld [vmem:[#allocation2 + $0x6] sm:$0xff]  ;;  %v1336_v40 = vstv %s2655_s7 }
 0x20c   : > { %1228 = vrot.lane.b32.xlu0 %v1223_v53, %s1932_s11  ;;  %v2669_v53 = vld [vmem:[#allocation3 + $0x6] sm:$0xff] }
 0x20d   : > { %v889_v37 = vpop.permute.xlu1 %888  ;;  %v917_v60 = vpop.permute.xlu2 %916 }
 0x20e   : > { %v893_v47 = vadd.f32 %v889_v37, %v880_v32  ;;  %v904_v42 = vpop.permute.xlu0 %903  ;;  %v1265_v32 = vmul.f32 %v1264_v12, %v2564_v20 }
 0x210   : > { %v908_v55 = vadd.f32 %v904_v42, %v893_v47  ;;  %v1279_v47 = vmul.f32 %v1277_v13, %v2578_v1 }
 0x212   : > { %v921_v48 = vadd.f32 %v917_v60, %v908_v55  ;;  %v1337_v60 = vmul.f32 %v1336_v40, %v2666_v39 }
 0x213   : > { %1241 = vrot.lane.b32.xlu1 %v1237_v57, %s1933_s19  ;;  %1200 = vrot.lane.b32.xlu2 %v1195_v58, %s1931_s10 }
 0x214   : > { %1254 = vrot.lane.b32.xlu0 %v1250_v6, %s1933_s19  ;;  %v2680_v6 = vld [vmem:[#allocation3 + $0xe] sm:$0xff] }
 0x215   : > { %v915_v45 = vpop.permute.xlu1 %914  ;;  %v943_v8 = vpop.permute.xlu2 %942 }
 0x216   : > { %v920_v30 = vadd.f32 %v915_v45, %v907_v41  ;;  %v930_v50 = vpop.permute.xlu0 %929  ;;  %v1349_v41 = vstv %s2658_s9 }
 0x217   : > { %v1350_v42 = vmul.f32 %v1349_v41, %v2669_v53 }
 0x218   : > { %v935_v36 = vadd.f32 %v930_v50, %v920_v30  ;;  %v1306_v30 = vmul.f32 %v1305_v31, %v2567_v7  ;;  %v1364_v50 = vstv %s2674_s12 }
 0x21a   : > { %v948_v11 = vadd.f32 %v943_v8, %v935_v36  ;;  %v1351_v8 = vmul.f32 %v1349_v41, %v2680_v6  ;;  %v1448_v41 = vstv %s2724_s3 }
 0x21b   : > { %1256 = vrot.lane.b32.xlu1 %v1251_v54, %s1933_s19  ;;  %1226 = vrot.lane.b32.xlu2 %v1222_v23, %s1932_s11 }
 0x21c   : > { %1271 = vrot.lane.b32.xlu0 %v1266_v43, %s1934_s22  ;;  %v957_v0 = vadd.f32 %v955_v5, %v948_v11  ;;  %v1377_v11 = vstv %s2682_s17  ;;  %v1392_v43 = vstv %s2686_s20  ;;  %s1543_s20 = scalar_lea.sflag [#allocation8], %s2042_s27 }
 0x21d   : > { %v932_v10 = vpop.permute.xlu1 %931  ;;  %v976_v22 = vpop.permute.xlu2 %975  ;;  %v1379_v31 = vmul.f32 %v1377_v11, %v2680_v6 }
 0x21e   : > { %v936_v14 = vadd.f32 %v932_v10, %v921_v48  ;;  %v945_v4 = vpop.permute.xlu0 %944  ;;  %v964_v38 = vadd.f32 %v962_v63, %v957_v0  ;;  %v2684_v48 = vld [vmem:[#allocation2 + $0xe] sm:$0xff]  ;;  %v1378_v63 = vmul.f32 %v1377_v11, %v2669_v53  ;;  %v1393_v10 = vmul.f32 %v1392_v43, %v2666_v39 }
 0x21f   : > { %v1366_v24 = vmul.f32 %v1364_v50, %v2684_v48  ;;  %v1338_v0 = vmul.f32 %v1336_v40, %v2684_v48  ;;  %v1406_v40 = vmul.f32 %v1405_v44, %v2669_v53 }
 0x220   : > { %v949_v59 = vadd.f32 %v945_v4, %v936_v14 }
 0x222   : > { %v958_v16 = vadd.f32 %v956_v18, %v949_v59  ;;  %v1394_v59 = vmul.f32 %v1392_v43, %v2684_v48 }
 0x223   : > { %1282 = vrot.lane.b32.xlu1 %v1278_v29, %s1934_s22  ;;  %1243 = vrot.lane.b32.xlu2 %v1238_v17, %s1933_s19  ;;  %v1365_v29 = vmul.f32 %v1364_v50, %v2666_v39  ;;  %v1407_v17 = vmul.f32 %v1405_v44, %v2680_v6  ;;  %v1476_v50 = vstv %s2733_s5 }
 0x224   : > { %1297 = vrot.lane.b32.xlu0 %v1293_v61, %s1935_s26  ;;  %v965_v26 = vadd.f32 %v963_v25, %v958_v16 }
 0x225   : > { %v974_v21 = vpop.permute.xlu1 %973  ;;  %v1002_v34 = vpop.permute.xlu2 %1001 }
 0x226   : > { %v979_v19 = vadd.f32 %v974_v21, %v964_v38  ;;  %v987_v27 = vpop.permute.xlu0 %986  ;;  %v980_v56 = vadd.f32 %v976_v22, %v965_v26 }
 0x228   : > { %v992_v33 = vadd.f32 %v987_v27, %v979_v19  ;;  %v1433_v19 = vstv %s2708_s30 }
 0x22a   : > { %v1007_v9 = vadd.f32 %v1002_v34, %v992_v33  ;;  %v1420_v34 = vstv %s2705_s29  ;;  %v1434_v33 = vmul.f32 %v1433_v19, %v2669_v53 }
 0x22b   : > { %1299 = vrot.lane.b32.xlu1 %v1294_v46, %s1935_s26  ;;  %1269 = vrot.lane.b32.xlu2 %v1265_v32, %s1934_s22 }
 0x22c   : > { %1312 = vrot.lane.b32.xlu0 %v1307_v2, %s1935_s26 }
 0x22d   : > { %v989_v51 = vpop.permute.xlu1 %988  ;;  %v1017_v35 = vpop.permute.xlu2 %1016 }
 0x22e   : > { %v993_v28 = vadd.f32 %v989_v51, %v980_v56  ;;  %v1004_v49 = vpop.permute.xlu0 %1003  ;;  %v1421_v56 = vmul.f32 %v1420_v34, %v2666_v39 }
 0x230   : > { %v1008_v37 = vadd.f32 %v1004_v49, %v993_v28  ;;  %v1435_v49 = vmul.f32 %v1433_v19, %v2680_v6 }
 0x232   : > { %v1021_v15 = vadd.f32 %v1017_v35, %v1008_v37  ;;  %v1145_v37 = vstv %s2720_s23  ;;  %s1875_s23 = scalar_lea.hbm %s2810_s2, 32 }
 0x233   : > { %1341 = vrot.lane.b32.xlu1 %v1337_v60, %s1930_s8  ;;  %1284 = vrot.lane.b32.xlu2 %v1279_v47, %s1934_s22  ;;  %v1450_v47 = vmul.f32 %v1448_v41, %v2684_v48 }
 0x234   : > { %1354 = vrot.lane.b32.xlu0 %v1350_v42, %s1930_s8 }
 0x235   : > { %v1015_v52 = vpop.permute.xlu1 %1014  ;;  %v1043_v55 = vpop.permute.xlu2 %1042 }
 0x236   : > { %v1020_v57 = vadd.f32 %v1015_v52, %v1007_v9  ;;  %v1030_v58 = vpop.permute.xlu0 %1029 }
 0x238   : > { %v1035_v45 = vadd.f32 %v1030_v58, %v1020_v57 }
 0x23a   : > { %v1048_v36 = vadd.f32 %v1043_v55, %v1035_v45 }
 0x23b   : > { %1356 = vrot.lane.b32.xlu1 %v1351_v8, %s1930_s8  ;;  %1310 = vrot.lane.b32.xlu2 %v1306_v30, %s1935_s26  ;;  %v1461_v8 = vstv %s2730_s4 }
 0x23c   : > { %1371 = vrot.lane.b32.xlu0 %v1366_v24, %s1931_s10 }
 0x23d   : > { %v1032_v54 = vpop.permute.xlu1 %1031  ;;  %v1060_v12 = vpop.permute.xlu2 %1059 }
 0x23e   : > { %v1036_v23 = vadd.f32 %v1032_v54, %v1021_v15  ;;  %v1045_v62 = vpop.permute.xlu0 %1044  ;;  %v1146_v15 = vmul.f32 %v1145_v37, %v2567_v7  ;;  %v1422_v54 = vmul.f32 %v1420_v34, %v2684_v48  ;;  %v1477_v7 = vmul.f32 %v1476_v50, %v2666_v39 }
 0x240   : > { %v1049_v5 = vadd.f32 %v1045_v62, %v1036_v23  ;;  %v1147_v23 = vmul.f32 %v1145_v37, %v2578_v1 }
 0x242   : > { %v1064_v22 = vadd.f32 %v1060_v12, %v1049_v5 }
 0x243   : > { %1382 = vrot.lane.b32.xlu1 %v1378_v63, %s1931_s10  ;;  %1343 = vrot.lane.b32.xlu2 %v1338_v0, %s1930_s8  ;;  %s2718_s8 = sld [smem:[#allocation5 + $0x23]] }
 0x244   : > { %1397 = vrot.lane.b32.xlu0 %v1393_v10, %s1932_s11 }
 0x245   : > { %v1058_v14 = vpop.permute.xlu1 %1057  ;;  %v1086_v4 = vpop.permute.xlu2 %1085 }
 0x246   : > { %v1063_v13 = vadd.f32 %v1058_v14, %v1048_v36  ;;  %v1071_v38 = vpop.permute.xlu0 %1070  ;;  %v1462_v36 = vmul.f32 %v1461_v8, %v2669_v53  ;;  %v1449_v14 = vmul.f32 %v1448_v41, %v2666_v39 }
 0x248   : > { %v1076_v18 = vadd.f32 %v1071_v38, %v1063_v13 }
 0x249   : > { %v1138_v35 = vstv %s2718_s8 }
 0x24a   : > { %v1091_v16 = vadd.f32 %v1086_v4, %v1076_v18  ;;  %v1139_v42 = vmul.f32 %v1138_v35, %v2564_v20  ;;  %v1140_v20 = vmul.f32 %v1138_v35, %v2582_v3 }
 0x24b   : > { %1399 = vrot.lane.b32.xlu1 %v1394_v59, %s1932_s11  ;;  %1369 = vrot.lane.b32.xlu2 %v1365_v29, %s1931_s10  ;;  %v1463_v29 = vmul.f32 %v1461_v8, %v2680_v6 }
 0x24c   : > { %1412 = vrot.lane.b32.xlu0 %v1407_v17, %s1932_s11 }
 0x24d   : > { %v1073_v61 = vpop.permute.xlu1 %1072  ;;  %v1101_v25 = vpop.permute.xlu2 %1100 }
 0x24e   : > { %v1077_v26 = vadd.f32 %v1073_v61, %v1064_v22  ;;  %v1088_v21 = vpop.permute.xlu0 %1087  ;;  %v1478_v22 = vmul.f32 %v1476_v50, %v2684_v48 }
 0x250   : > { %v1092_v27 = vadd.f32 %v1088_v21, %v1077_v26 }
 0x252   : > { %v1105_v46 = vadd.f32 %v1101_v25, %v1092_v27 }
 0x253   : > { %1425 = vrot.lane.b32.xlu1 %v1421_v56, %s1933_s19  ;;  %1384 = vrot.lane.b32.xlu2 %v1379_v31, %s1931_s10  ;;  %s2747_s10 = sld [smem:[#allocation5 + $0xb0]] }
 0x254   : > { %1438 = vrot.lane.b32.xlu0 %v1434_v33, %s1933_s19 }
 0x255   : > { %v1099_v32 = vpop.permute.xlu1 %1098  ;;  %v1127_v2 = vpop.permute.xlu2 %1126 }
 0x256   : > { %v1104_v9 = vadd.f32 %v1099_v32, %v1091_v16  ;;  %v1114_v51 = vpop.permute.xlu0 %1113 }
 0x258   : > { %v1119_v28 = vadd.f32 %v1114_v51, %v1104_v9 }
 0x259   : > { %v1489_v0 = vstv %s2747_s10 }
 0x25a   : > { %v1132_v60 = vadd.f32 %v1127_v2, %v1119_v28  ;;  %v1491_v1 = vmul.f32 %v1489_v0, %v2680_v6  ;;  %v1490_v26 = vmul.f32 %v1489_v0, %v2669_v53 }
 0x25b   : > { %1440 = vrot.lane.b32.xlu1 %v1435_v49, %s1933_s19  ;;  %1410 = vrot.lane.b32.xlu2 %v1406_v40, %s1932_s11  ;;  %s1723_s11 = sld [smem:[#allocation5 + $0x2a]] }
 0x25c   : > { %1455 = vrot.lane.b32.xlu0 %v1450_v47, %s1934_s22  ;;  %v1141_v52 = vadd.f32 %v1139_v42, %v1132_v60 }
 0x25d   : > { %v1116_v55 = vpop.permute.xlu1 %1115  ;;  %v1160_v57 = vpop.permute.xlu2 %1159 }
 0x25e   : > { %v1120_v58 = vadd.f32 %v1116_v55, %v1105_v46  ;;  %v1129_v45 = vpop.permute.xlu0 %1128  ;;  %v1148_v30 = vadd.f32 %v1146_v15, %v1141_v52 }
 0x260   : > { %v1133_v24 = vadd.f32 %v1129_v45, %v1120_v58 }
 0x261   : > { %v1322_v55 = vstv %s1723_s11 }
 0x262   : > { %v1142_v12 = vadd.f32 %v1140_v20, %v1133_v24 }
 0x263   : > { %1466 = vrot.lane.b32.xlu1 %v1462_v36, %s1934_s22  ;;  %1427 = vrot.lane.b32.xlu2 %v1422_v54, %s1933_s19  ;;  %s1724_s19 = sld [smem:[#allocation5 + $0xaa]] }
 0x264   : > { %1481 = vrot.lane.b32.xlu0 %v1477_v7, %s1935_s26  ;;  %v1149_v62 = vadd.f32 %v1147_v23, %v1142_v12 }
 0x265   : > { %v1158_v11 = vpop.permute.xlu1 %1157  ;;  %v1186_v3 = vpop.permute.xlu2 %1185 }
 0x266   : > { %v1163_v43 = vadd.f32 %v1158_v11, %v1148_v30  ;;  %v1171_v5 = vpop.permute.xlu0 %1170  ;;  %v1164_v63 = vadd.f32 %v1160_v57, %v1149_v62  ;;  %v1323_v30 = vmul.f32 %v1322_v55, %v2666_v39  ;;  %v1324_v62 = vmul.f32 %v1322_v55, %v2684_v48 }
 0x268   : > { %v1176_v10 = vadd.f32 %v1171_v5, %v1163_v43 }
 0x269   : > { %v1329_v45 = vstv %s1724_s19 }
 0x26a   : > { %v1191_v4 = vadd.f32 %v1186_v3, %v1176_v10  ;;  %v1330_v20 = vmul.f32 %v1329_v45, %v2669_v53  ;;  %v1331_v43 = vmul.f32 %v1329_v45, %v2680_v6 }
 0x26b   : > { %1483 = vrot.lane.b32.xlu1 %v1478_v22, %s1935_s26  ;;  %1453 = vrot.lane.b32.xlu2 %v1449_v14, %s1934_s22 }
 0x26c   : > { %1496 = vrot.lane.b32.xlu0 %v1491_v1, %s1935_s26 }
 0x26d   : > { %v1173_v13 = vpop.permute.xlu1 %1172  ;;  %v1201_v38 = vpop.permute.xlu2 %1200 }
 0x26e   : > { %v1177_v44 = vadd.f32 %v1173_v13, %v1164_v63  ;;  %v1188_v18 = vpop.permute.xlu0 %1187 }
 0x270   : > { %v1192_v59 = vadd.f32 %v1188_v18, %v1177_v44 }
 0x272   : > { %v1205_v17 = vadd.f32 %v1201_v38, %v1192_v59 }
 0x273   : > { %1468 = vrot.lane.b32.xlu2 %v1463_v29, %s1934_s22  ;;  %s1639_s22 = sshll.u32 %s2042_s27, 4 }
 0x274   : > { %s145_s12 = scalar_lea.vmem [#allocation9], %s1639_s22 }
 0x275   : > { %v1199_v16 = vpop.permute.xlu1 %1198  ;;  %v1227_v61 = vpop.permute.xlu2 %1226 }
 0x276   : > { %v1214_v25 = vpop.permute.xlu0 %1213  ;;  %v1204_v27 = vadd.f32 %v1199_v16, %v1191_v4 }
 0x278   : > { %v1219_v33 = vadd.f32 %v1214_v25, %v1204_v27 }
 0x27a   : > { %v1232_v2 = vadd.f32 %v1227_v61, %v1219_v33 }
 0x27b   : > { %1494 = vrot.lane.b32.xlu2 %v1490_v26, %s1935_s26  ;;  %s1745_s26 = sshll.u32 %s1977_s0, 4  ;;  %s1555_s0 = sshll.u32 %s145_s12, 4  ;;  %s1556_s0 = int_to_ptr.vmem [resolvable:$true] %s1555_s0 }
 0x27c   : > { %s1554_s9 = scalar_lea.hbm %s2810_s2, %s1745_s26 }
 0x27d   : > { %v1216_v21 = vpop.permute.xlu1 %1215  ;;  %v1244_v34 = vpop.permute.xlu2 %1243  ;;  %s1557_s17 = sshll.u32 %s1554_s9, 4  ;;  %s1558_s17 = int_to_ptr.hbm [resolvable:$true] %s1557_s17 }
 0x27e   : > { %v1229_v19 = vpop.permute.xlu0 %1228  ;;  %v1220_v32 = vadd.f32 %v1216_v21, %v1205_v17  ;;  %s1869_s28 = sshra.s32 %s1558_s17, 4  ;;  %s1870_s28 = int_to_ptr.hbm [resolvable:$true] %s1869_s28 }
 0x27f   : > { %s1871_s29 = scalar_lea.hbm %s1870_s28, 16  ;;  %p1876_p0 = scmp.lt.s32.totalorder %s1870_s28, %s2810_s2 }
 0x280   : > { %v1233_v28 = vadd.f32 %v1229_v19, %v1220_v32  ;;  %p1872_p6 = scmp.ne.s32.totalorder %s1870_s28, %s1871_s29  ;;  %p1877_p1 = scmp.lt.s32.totalorder %s1875_s23, %s1871_s29 }
 0x282   : > { %v1248_v41 = vadd.f32 %v1244_v34, %v1233_v28  ;;  %p1873_p9 = pnand %p1872_p6, %p2006_p11  ;;  %p1878_p3 = por %p1877_p1, %p1876_p0 }
 0x284   : > { %p1874_p13 = pneg %p1873_p9 }
 0x285   : > { %v1242_v56 = vpop.permute.xlu1 %1241  ;;  %v1270_v31 = vpop.permute.xlu2 %1269 }
 0x286   : > { %v1255_v46 = vpop.permute.xlu0 %1254  ;;  %v1247_v9 = vadd.f32 %v1242_v56, %v1232_v2  ;;  %p1879_p4 = pnand %p1878_p3, %p1874_p13 }
 0x288   : > { %v1260_v40 = vadd.f32 %v1255_v46, %v1247_v9 }
 0x28a   : > { %v1275_v60 = vadd.f32 %v1270_v31, %v1260_v40 }
 0x28d   : > { %v1257_v51 = vpop.permute.xlu1 %1256  ;;  %v1285_v35 = vpop.permute.xlu2 %1284 }
 0x28e   : > { %v1272_v49 = vpop.permute.xlu0 %1271  ;;  %v1261_v37 = vadd.f32 %v1257_v51, %v1248_v41 }
 0x290   : > { %v1276_v57 = vadd.f32 %v1272_v49, %v1261_v37 }
 0x292   : > { %v1289_v50 = vadd.f32 %v1285_v35, %v1276_v57 }
 0x295   : > { %v1283_v47 = vpop.permute.xlu1 %1282  ;;  %v1311_v42 = vpop.permute.xlu2 %1310 }
 0x296   : > { %v1288_v15 = vadd.f32 %v1283_v47, %v1275_v60  ;;  %v1298_v52 = vpop.permute.xlu0 %1297 }
 0x298   : > { %v1303_v58 = vadd.f32 %v1298_v52, %v1288_v15 }
 0x29a   : > { %v1316_v8 = vadd.f32 %v1311_v42, %v1303_v58 }
 0x29c   : > { %v1325_v24 = vadd.f32 %v1323_v30, %v1316_v8 }
 0x29d   : > { %v1300_v36 = vpop.permute.xlu1 %1299  ;;  %v1344_v54 = vpop.permute.xlu2 %1343 }
 0x29e   : > { %v1304_v12 = vadd.f32 %v1300_v36, %v1289_v50  ;;  %v1313_v7 = vpop.permute.xlu0 %1312  ;;  %v1332_v23 = vadd.f32 %v1330_v20, %v1325_v24 }
 0x2a0   : > { %v1317_v11 = vadd.f32 %v1313_v7, %v1304_v12 }
 0x2a2   : > { %v1326_v3 = vadd.f32 %v1324_v62, %v1317_v11 }
 0x2a4   : > { %v1333_v5 = vadd.f32 %v1331_v43, %v1326_v3 }
 0x2a5   : > { %v1342_v63 = vpop.permute.xlu1 %1341  ;;  %v1370_v0 = vpop.permute.xlu2 %1369 }
 0x2a6   : > { %v1355_v10 = vpop.permute.xlu0 %1354  ;;  %v1347_v13 = vadd.f32 %v1342_v63, %v1332_v23  ;;  %v1348_v59 = vadd.f32 %v1344_v54, %v1333_v5 }
 0x2a8   : > { %v1360_v38 = vadd.f32 %v1355_v10, %v1347_v13 }
 0x2aa   : > { %v1375_v17 = vadd.f32 %v1370_v0, %v1360_v38 }
 0x2ad   : > { %v1357_v39 = vpop.permute.xlu1 %1356  ;;  %v1385_v22 = vpop.permute.xlu2 %1384 }
 0x2ae   : > { %v1372_v14 = vpop.permute.xlu0 %1371  ;;  %v1361_v29 = vadd.f32 %v1357_v39, %v1348_v59 }
 0x2b0   : > { %v1376_v6 = vadd.f32 %v1372_v14, %v1361_v29 }
 0x2b2   : > { %v1389_v34 = vadd.f32 %v1385_v22, %v1376_v6 }
 0x2b5   : > { %v1383_v53 = vpop.permute.xlu1 %1382  ;;  %v1411_v1 = vpop.permute.xlu2 %1410 }
 0x2b6   : > { %v1398_v4 = vpop.permute.xlu0 %1397  ;;  %v1388_v16 = vadd.f32 %v1383_v53, %v1375_v17 }
 0x2b8   : > { %v1403_v26 = vadd.f32 %v1398_v4, %v1388_v16 }
 0x2ba   : > { %v1416_v27 = vadd.f32 %v1411_v1, %v1403_v26 }
 0x2bd   : > { %v1400_v44 = vpop.permute.xlu1 %1399  ;;  %v1428_v18 = vpop.permute.xlu2 %1427 }
 0x2be   : > { %v1413_v48 = vpop.permute.xlu0 %1412  ;;  %v1404_v19 = vadd.f32 %v1400_v44, %v1389_v34 }
 0x2c0   : > { %v1417_v33 = vadd.f32 %v1413_v48, %v1404_v19 }
 0x2c2   : > { %v1432_v9 = vadd.f32 %v1428_v18, %v1417_v33 }
 0x2c5   : > { %v1426_v61 = vpop.permute.xlu1 %1425  ;;  %v1454_v25 = vpop.permute.xlu2 %1453 }
 0x2c6   : > { %v1439_v21 = vpop.permute.xlu0 %1438  ;;  %v1431_v56 = vadd.f32 %v1426_v61, %v1416_v27 }
 0x2c8   : > { %v1444_v2 = vadd.f32 %v1439_v21, %v1431_v56 }
 0x2ca   : > { %v1459_v35 = vadd.f32 %v1454_v25, %v1444_v2 }
 0x2cd   : > { %v1441_v31 = vpop.permute.xlu1 %1440  ;;  %v1469_v32 = vpop.permute.xlu2 %1468 }
 0x2ce   : > { %v1456_v46 = vpop.permute.xlu0 %1455  ;;  %v1445_v51 = vadd.f32 %v1441_v31, %v1432_v9 }
 0x2d0   : > { %v1460_v41 = vadd.f32 %v1456_v46, %v1445_v51 }
 0x2d2   : > { %v1473_v15 = vadd.f32 %v1469_v32, %v1460_v41 }
 0x2d5   : > { %v1467_v28 = vpop.permute.xlu1 %1466  ;;  %v1495_v60 = vpop.permute.xlu2 %1494 }
 0x2d6   : > { %v1472_v49 = vadd.f32 %v1467_v28, %v1459_v35  ;;  %v1482_v40 = vpop.permute.xlu0 %1481 }
 0x2d8   : > { %v1487_v37 = vadd.f32 %v1482_v40, %v1472_v49 }
 0x2da   : > { %v1500_v47 = vadd.f32 %v1495_v60, %v1487_v37 }
 0x2dc   : > { %v1737_v42 = vmul.f32 -1.442695, %v1500_v47 }
 0x2dd   : > { %v1484_v52 = vpop.permute.xlu1 %1483 }
 0x2de   : > { %1805 = vpow2.f32 %v1737_v42  ;;  %v1488_v55 = vadd.f32 %v1484_v52, %v1473_v15  ;;  %v1497_v57 = vpop.permute.xlu0 %1496 }
 0x2e0   : > { %v1501_v58 = vadd.f32 %v1497_v57, %v1488_v55 }
 0x2e2   : > { %v1738_v45 = vmul.f32 -1.442695, %v1501_v58 }
 0x2e4   : > { %v1806_v8 = vpop.eup %1805  ;;  %1807 = vpow2.f32 %v1738_v45 }
 0x2e5   : > { %v1508_v30 = vadd.f32 1.0, %v1806_v8 }
 0x2e7   : > { %1809 = vrcp.f32 %v1508_v30  ;;  %v1521_v12 = vand.u32 2147483648, %v1508_v30  ;;  %v1519_v23 = vand.u32 2147483647, %v1508_v30  ;;  %vm1515_vm5 = vweird.f32 %v1508_v30 }
 0x2e9   : > { %v1522_v43 = vor.u32 1.1754944e-38, %v1521_v12  ;;  %vm1520_vm7 = vcmp.eq.f32.partialorder %v1519_v23, 8.507059e+37 }
 0x2ea   : > { %v1808_v50 = vpop.eup %1807 }
 0x2eb   : > { %v1509_v20 = vadd.f32 1.0, %v1808_v50 }
 0x2ed   : > { %v1810_v24 = vpop.eup %1809  ;;  %1811 = vrcp.f32 %v1509_v20  ;;  %v1536_v0 = vand.u32 2147483648, %v1509_v20  ;;  %v1534_v22 = vand.u32 2147483647, %v1509_v20  ;;  %vm1530_vm9 = vweird.f32 %v1509_v20 }
 0x2ee   : > { %v1511_v36 = vmul.f32 %v1810_v24, %v1508_v30  ;;  %vm1516_vm4 = vweird.f32 %v1810_v24 }
 0x2ef   : > { %vm1517_vm6 = vmor %vm1515_vm5, %vm1516_vm4  ;;  %v1537_v53 = vor.u32 1.1754944e-38, %v1536_v0  ;;  %vm1535_vm11 = vcmp.eq.f32.partialorder %v1534_v22, 8.507059e+37 }
 0x2f0   : > { %v1512_v54 = vsub.f32 1.0, %v1511_v36 }
 0x2f2   : > { %v1513_v7 = vmul.f32 %v1810_v24, %v1512_v54 }
 0x2f3   : > { %v1812_v62 = vpop.eup %1811 }
 0x2f4   : > { %v1514_v11 = vadd.f32 %v1810_v24, %v1513_v7  ;;  %v1526_v3 = vmul.f32 %v1812_v62, %v1509_v20  ;;  %vm1531_vm8 = vweird.f32 %v1812_v62 }
 0x2f5   : > { %vm1532_vm10 = vmor %vm1530_vm9, %vm1531_vm8 }
 0x2f6   : > { %v1518_v5 = vsel %vm1517_vm6, %v1810_v24, %v1514_v11  ;;  %v1527_v63 = vsub.f32 1.0, %v1526_v3 }
 0x2f7   : > { %v1523_v10 = vsel %vm1520_vm7, %v1522_v43, %v1518_v5 }
 0x2f8   : > { %v1528_v39 = vmul.f32 %v1812_v62, %v1527_v63  ;;  %1540 = vst.msk [vmem:[%s145_s12] sm:$0xff] %vm154_vm1, %v1523_v10 }
 0x2fa   : > { %v1529_v14 = vadd.f32 %v1812_v62, %v1528_v39 }
 0x2fc   : > { %v1533_v1 = vsel %vm1532_vm10, %v1812_v62, %v1529_v14 }
 0x2fd   : > { %v1538_v4 = vsel %vm1535_vm11, %v1537_v53, %v1533_v1 }
 0x2fe   : > { %1541 = vst.msk [vmem:[%s145_s12 + $0x8] sm:$0xff] %vm154_vm1, %v1538_v4 }
 0x2ff   : > { %1882 = shalt.err (!%p1879_p4)
}
 0x300   : > { %s1936_s27 = smov 128   ;;  %s1937_s5 = smov 8  }
 0x301   : > { %1748 = dma.vmem_to_hbm [thread:$0]  (%p2006_p11), %s1556_s0, 256, %s1558_s17, %s1543_s20, %s1936_s27, %s1936_s27, %s1937_s5  }
 0x302 PF: > { %s1572_s10 = sand.u32 1, %s1911_s13   ;;  %p2816_p7 = scmp.ge.s32.totalorder %s1923_s16, 2 }
 0x303   : > { %s1573_s11 = scalar_lea.sflag [#allocation8], %s1572_s10 }
 0x304   : > { %p1755_p5 = pnand %p2816_p7, %p2010_p12 }
 0x306   : > { %p1756_p8 = pneg %p1755_p5 }
 0x308   : > { %1906 = dma.done.wait (%p1756_p8), %s1573_s11, 256  }
 0x309   : > { %1908 = vsyncadd (%p1756_p8), %s1573_s11, 4294967040  ;;  %p23_p10 = scmp.ge.s32.totalorder %s1981_s18, 4   ;;  %s2817_s13 = smov %s1915_s14 }
 0x30a   : > { %s2818_s14 = smov %s1919_s15  ;;  %s2819_s15 = smov %s1993_s21 }
 0x30b   : > { %s2820_s16 = smov %s1981_s18  ;;  %25 = sbr.rel (!%p23_p10) target bundleno = 11 (0xb), region = 69 }
 0x310   :  { %1579 = vsyncpa [#allocation7], 1 }
 0x311   :  { %1581 = vsyncpa [#allocation7 + $0x1], 1 }
 0x312   :  { %1582 = vsyncpa [#allocation8], 1 }
 0x313   :  { %1584 = vsyncpa [#allocation8 + $0x1], 1 }

</bundles_post_ra>
